<compile_context>
chip_gen: v5e
topology: v5e:2x2
jax: 0.10.0
libtpu: 0.0.40
codegen_flags: <defaults>
</compile_context>

<pallas_src>
import math
import functools

import jax
import jax.numpy as jnp
from jax import lax
from jax.experimental import pallas as pl
from jax.experimental.pallas import tpu as pltpu

S = 50                 # FilterLayer.max_seq_len
S_PAD = 56             # seq padded to a sublane multiple (zeros, exact)
H = 64                 # FilterLayer / Intermediate hidden size
F = S // 2 + 1         # rfft frequency bins = 26
FP = 32                # F zero-padded to a sublane multiple (exact)
EPS = 1e-12            # LayerNorm eps
_SQRT_2_OVER_PI = math.sqrt(2.0 / math.pi)


# ----------------------------- in-kernel math -------------------------------

def _layernorm(x, gamma, beta):
    u = jnp.mean(x, axis=-1, keepdims=True)
    s = jnp.mean((x - u) ** 2, axis=-1, keepdims=True)
    return gamma * ((x - u) * lax.rsqrt(s + EPS)) + beta


def _gelu_tanh(x):
    # tanh-approximate GELU: EUP tanh + a handful of VALU ops (perf review item).
    # Deviates from the module's exact-erf GELU by ~1e-3 absolute.
    return 0.5 * x * (1.0 + jnp.tanh(_SQRT_2_OVER_PI * (x + 0.044715 * (x * x * x))))


# --------------------------------- kernel -----------------------------------

def encoder_kernel(x_ref, emb_ref, keep_ref,
                   c_ref, ir4_ref, wr2_ref, wi2_ref,
                   g1_ref, b1_ref,
                   w1_ref, bb1_ref, w2_ref, bb2_ref,
                   g2_ref, b2_ref,
                   o_ref, *, bt, mxu_dtype):
    x = x_ref[...]                                         # (R, H) f32, R = bt*S_PAD

    # --- FilterLayer: rfft -> complex weight -> irfft as batched DFT matmuls ---
    # (R, H) -> (bt, S_PAD, H) is a tile-aligned (free) reshape since S_PAD % 8 == 0.
    x3 = x.reshape(bt, S_PAD, H).astype(mxu_dtype)
    cb = jnp.broadcast_to(c_ref[...], (bt, 2 * FP, S_PAD))
    # XF = [rfft_re; rfft_im] per sample, computed once (no [C;C] duplication).
    xf = jnp.einsum('bfs,bsh->bfh', cb, x3,
                    preferred_element_type=jnp.float32)    # (bt, 2FP, H) f32
    # Regrouped complex multiply: g = [XF*[wr;wr] ; XF*[wi;wi]]
    g = jnp.concatenate([xf * wr2_ref[...], xf * wi2_ref[...]], axis=1)  # (bt, 4FP, H)
    irb = jnp.broadcast_to(ir4_ref[...], (bt, S_PAD, 4 * FP))
    filt = jnp.einsum('bsf,bfh->bsh', irb, g.astype(mxu_dtype),
                      preferred_element_type=jnp.float32)  # (bt, S_PAD, H)
    filt = filt.reshape(bt * S_PAD, H)

    # out_dropout: identity in eval mode
    h1 = _layernorm(filt + x, g1_ref[...], b1_ref[...])

    # --- Intermediate (position-wise FFN) on the whole (R, H) slab ---
    ff = jnp.dot(h1.astype(mxu_dtype), w1_ref[...],
                 preferred_element_type=jnp.float32) + bb1_ref[...]
    ff = _gelu_tanh(ff)
    h2 = jnp.dot(ff.astype(mxu_dtype), w2_ref[...],
                 preferred_element_type=jnp.float32) + bb2_ref[...]
    out = _layernorm(h2 + h1, g2_ref[...], b2_ref[...])

    # --- Encoder tail (layer_idx == 0): += emb_moe ; *= ~timeline_mask ---
    o_ref[...] = (out + emb_ref[...]) * keep_ref[...]


# ------------------------ precomputed filter constants -----------------------

def build_filter_constants(wr, wi):
    """Exact real-matrix form of ortho rfft/irfft along seq, fused with the
    complex filter weights.

    Per sample:  filt = IRr @ yr + IRi @ yi,  (yr, yi) = complex-weighted rfft.
    Regrouped by weight factor:
        filt = [IRr, IRi, IRi, -IRr] @ [XF*[wr;wr] ; XF*[wi;wi]],
    with XF = [Cr; Ci] @ x.  Frequency padded F=26 -> FP=32 and seq padded
    S=50 -> S_PAD=56 with zeros (numerically exact).
    """
    eye_s = jnp.eye(S, dtype=jnp.float32)
    fwd = jnp.fft.rfft(eye_s, axis=0, norm="ortho")                          # (F, S)
    cr = jnp.real(fwd).astype(jnp.float32)
    ci = jnp.imag(fwd).astype(jnp.float32)
    eye_f = jnp.eye(F, dtype=jnp.complex64)
    irr = jnp.fft.irfft(eye_f, n=S, axis=0, norm="ortho").astype(jnp.float32)        # (S, F)
    iri = jnp.fft.irfft(1j * eye_f, n=S, axis=0, norm="ortho").astype(jnp.float32)   # (S, F)

    pf, ps = FP - F, S_PAD - S
    cr = jnp.pad(cr, ((0, pf), (0, ps)))
    ci = jnp.pad(ci, ((0, pf), (0, ps)))
    irr = jnp.pad(irr, ((0, ps), (0, pf)))
    iri = jnp.pad(iri, ((0, ps), (0, pf)))

    c_mat = jnp.concatenate([cr, ci], axis=0)                        # (2FP, S_PAD)
    ir4 = jnp.concatenate([irr, iri, iri, -irr], axis=1)             # (S_PAD, 4FP)

    wr_p = jnp.pad(wr.astype(jnp.float32), ((0, pf), (0, 0)))        # (FP, H)
    wi_p = jnp.pad(wi.astype(jnp.float32), ((0, pf), (0, 0)))
    wr2 = jnp.concatenate([wr_p, wr_p], axis=0)                      # (2FP, H)
    wi2 = jnp.concatenate([wi_p, wi_p], axis=0)                      # (2FP, H)
    return c_mat, ir4, wr2, wi2


# --------------------------------- wrapper ----------------------------------

def encoder_forward(hidden_states, attention_mask, emb_moe, timeline_mask,
                    params, *, block_batch=32, mxu_dtype=jnp.bfloat16):
    """Forward of FMLPRec Encoder (1 block, eval mode). Returns a 1-element list."""
    del attention_mask      # Layer.forward never calls SelfAttention
    B = hidden_states.shape[0]
    wr, wi, g1, b1, w1, bb1, w2, bb2, g2, b2 = params

    # Batch tile: at least 2 grid steps whenever B >= 2 (v7x dual-TensorCore),
    # otherwise as many samples per step as block_batch allows.
    Bt = 1 if B <= 1 else min(block_batch, (B + 1) // 2)
    Bp = ((B + Bt - 1) // Bt) * Bt
    n_steps = Bp // Bt
    R = Bt * S_PAD

    x = hidden_states.astype(jnp.float32)
    emb = emb_moe.astype(jnp.float32)
    keep = jnp.logical_not(timeline_mask).astype(jnp.float32)        # (B, S)

    # Pad batch B -> Bp and seq S -> S_PAD with zeros (padded rows sliced off later).
    x = jnp.pad(x, ((0, Bp - B), (0, S_PAD - S), (0, 0)))
    emb = jnp.pad(emb, ((0, Bp - B), (0, S_PAD - S), (0, 0)))
    keep = jnp.pad(keep, ((0, Bp - B), (0, S_PAD - S)))

    x2d = x.reshape(Bp * S_PAD, H)
    emb2d = emb.reshape(Bp * S_PAD, H)
    keep2d = keep.reshape(Bp * S_PAD, 1)

    c_mat, ir4, wr2, wi2 = build_filter_constants(wr, wi)
    c_mat = c_mat.astype(mxu_dtype)
    ir4 = ir4.astype(mxu_dtype)
    w1m = w1.astype(mxu_dtype)
    w2m = w2.astype(mxu_dtype)

    def rows(last):
        return pl.BlockSpec((R, last), lambda i: (i, 0))

    def const(shape):
        return pl.BlockSpec(shape, lambda i: (0, 0))      # all constants are rank-2

    kernel = functools.partial(encoder_kernel, bt=Bt, mxu_dtype=mxu_dtype)
    out2d = pl.pallas_call(
        kernel,
        out_shape=jax.ShapeDtypeStruct((Bp * S_PAD, H), jnp.float32),
        grid=(n_steps,),
        in_specs=[
            rows(H),                                   # hidden_states (2-D slab)
            rows(H),                                   # emb_moe
            rows(1),                                   # keep = ~timeline_mask
            const(c_mat.shape),                        # fwd DFT  [Cr; Ci]
            const(ir4.shape),                          # inv DFT  [IRr, IRi, IRi, -IRr]
            const(wr2.shape), const(wi2.shape),        # regrouped complex weights
            const((1, H)), const((1, H)),              # LayerNorm1 gamma/beta
            const((H, 4 * H)), const((1, 4 * H)),      # dense_1
            const((4 * H, H)), const((1, H)),          # dense_2
            const((1, H)), const((1, H)),              # LayerNorm2 gamma/beta
        ],
        out_specs=rows(H),
        compiler_params=pltpu.CompilerParams(
            dimension_semantics=("parallel",),
            vmem_limit_bytes=48 * 1024 * 1024),
    )(x2d, emb2d, keep2d, c_mat, ir4, wr2, wi2,
      g1, b1, w1m, bb1, w2m, bb2, g2, b2)

    out = out2d.reshape(Bp, S_PAD, H)[:B, :S]
    return [out]    # Encoder returns a list (output_all_encoded_layers=False)


# ----------------------- deterministic parameter setup ----------------------

def make_params(key):
    ks = jax.random.split(key, 5)
    # FilterLayer.complex_weight: (1, F, H, 2) = randn * 0.02
    cw = jax.random.normal(ks[0], (1, F, H, 2), jnp.float32) * 0.02
    wr, wi = cw[0, :, :, 0], cw[0, :, :, 1]
    # LayerNorms: ones / zeros
    g1, b1 = jnp.ones((1, H), jnp.float32), jnp.zeros((1, H), jnp.float32)
    g2, b2 = jnp.ones((1, H), jnp.float32), jnp.zeros((1, H), jnp.float32)
    # Intermediate Linears (torch default uniform init bounds)
    lim1 = 1.0 / math.sqrt(H)
    w1 = jax.random.uniform(ks[1], (H, 4 * H), jnp.float32, -lim1, lim1)
    bb1 = jax.random.uniform(ks[2], (1, 4 * H), jnp.float32, -lim1, lim1)
    lim2 = 1.0 / math.sqrt(4 * H)
    w2 = jax.random.uniform(ks[3], (4 * H, H), jnp.float32, -lim2, lim2)
    bb2 = jax.random.uniform(ks[4], (1, H), jnp.float32, -lim2, lim2)
    return wr, wi, g1, b1, w1, bb1, w2, bb2, g2, b2


# ----------------------- pure-JAX reference (for checking) -------------------

def encoder_reference(hidden_states, emb_moe, timeline_mask, params):
    wr, wi, g1, b1, w1, bb1, w2, bb2, g2, b2 = params
    x = hidden_states.astype(jnp.float32)
    xf = jnp.fft.rfft(x, axis=1, norm="ortho")
    filt = jnp.fft.irfft(xf * (wr + 1j * wi), n=S, axis=1, norm="ortho")

    def ln(v, g, b):
        u = v.mean(-1, keepdims=True)
        s2 = ((v - u) ** 2).mean(-1, keepdims=True)
        return g * ((v - u) / jnp.sqrt(s2 + EPS)) + b

    h1 = ln(filt + x, g1, b1)
    ff = h1 @ w1 + bb1
    ff = ff * 0.5 * (1.0 + jax.scipy.special.erf(ff / math.sqrt(2.0)))   # exact erf-GELU
    h2 = ff @ w2 + bb2
    out = ln(h2 + h1, g2, b2)
    return (out + emb_moe) * (~timeline_mask)[..., None].astype(jnp.float32)


# ----------------------------------- main ------------------------------------

if __name__ == "__main__":
    key = jax.random.PRNGKey(0)
    kx, kemb, kmask, kparam = jax.random.split(key, 4)
    B = 2
    hidden_states = jax.random.normal(kx, (B, S, H), jnp.float32)
    emb_moe = jax.random.normal(kemb, (B, S, H), jnp.float32)
    timeline_mask = jax.random.bernoulli(kmask, 0.3, (B, S))
    attention_mask = jnp.zeros((B, 1, S, S), jnp.float32)   # unused by this module
    params = make_params(kparam)

    out = encoder_forward(hidden_states, attention_mask, emb_moe,
                          timeline_mask, params)[0]
    out = jax.block_until_ready(out)

    assert out.shape == (B, S, H)
    assert bool(jnp.all(jnp.isfinite(out)))

    ref = encoder_reference(hidden_states, emb_moe, timeline_mask, params)
    max_err = float(jnp.max(jnp.abs(out - ref)))
    # bf16 MXU operands + tanh-GELU vs. exact-erf f32 reference (O(1) magnitudes).
    tol = 1e-1 if out.dtype == jnp.float32 else 1e-1
    assert max_err < tol, f"kernel/reference mismatch: max|diff|={max_err}"
    print("KERNEL_OK")
</pallas_src>

<mosaic_0001>
module attributes {stable_mosaic.version = 11 : i64} {
  func.func @encoder_kernel(%arg0: i32, %arg1: memref<56x64xf32, #tpu.memory_space<vmem>>, %arg2: memref<56x64xf32, #tpu.memory_space<vmem>>, %arg3: memref<56x1xf32, #tpu.memory_space<vmem>>, %arg4: memref<64x56xbf16, #tpu.memory_space<vmem>>, %arg5: memref<56x128xbf16, #tpu.memory_space<vmem>>, %arg6: memref<64x64xf32, #tpu.memory_space<vmem>>, %arg7: memref<64x64xf32, #tpu.memory_space<vmem>>, %arg8: memref<1x64xf32, #tpu.memory_space<vmem>>, %arg9: memref<1x64xf32, #tpu.memory_space<vmem>>, %arg10: memref<64x256xbf16, #tpu.memory_space<vmem>>, %arg11: memref<1x256xf32, #tpu.memory_space<vmem>>, %arg12: memref<256x64xbf16, #tpu.memory_space<vmem>>, %arg13: memref<1x64xf32, #tpu.memory_space<vmem>>, %arg14: memref<1x64xf32, #tpu.memory_space<vmem>>, %arg15: memref<1x64xf32, #tpu.memory_space<vmem>>, %arg16: memref<56x64xf32, #tpu.memory_space<vmem>>) attributes {dimension_semantics = [#tpu.dimension_semantics<parallel>], iteration_bounds = array<i64: 2>, scalar_prefetch = 0 : i64, scratch_operands = 0 : i64, tpu.core_type = #tpu.core_type<tc>, window_params = [{transform_indices = @transform_0, window_bounds = array<i64: 56, 64>}, {transform_indices = @transform_1, window_bounds = array<i64: 56, 64>}, {transform_indices = @transform_2, window_bounds = array<i64: 56, 1>}, {pipeline_mode = #tpu.pipeline_mode<synchronous>, transform_indices = @transform_3, window_bounds = array<i64: 64, 56>}, {pipeline_mode = #tpu.pipeline_mode<synchronous>, transform_indices = @transform_4, window_bounds = array<i64: 56, 128>}, {pipeline_mode = #tpu.pipeline_mode<synchronous>, transform_indices = @transform_5, window_bounds = array<i64: 64, 64>}, {pipeline_mode = #tpu.pipeline_mode<synchronous>, transform_indices = @transform_6, window_bounds = array<i64: 64, 64>}, {pipeline_mode = #tpu.pipeline_mode<synchronous>, transform_indices = @transform_7, window_bounds = array<i64: 1, 64>}, {pipeline_mode = #tpu.pipeline_mode<synchronous>, transform_indices = @transform_8, window_bounds = array<i64: 1, 64>}, {pipeline_mode = #tpu.pipeline_mode<synchronous>, transform_indices = @transform_9, window_bounds = array<i64: 64, 256>}, {pipeline_mode = #tpu.pipeline_mode<synchronous>, transform_indices = @transform_10, window_bounds = array<i64: 1, 256>}, {pipeline_mode = #tpu.pipeline_mode<synchronous>, transform_indices = @transform_11, window_bounds = array<i64: 256, 64>}, {pipeline_mode = #tpu.pipeline_mode<synchronous>, transform_indices = @transform_12, window_bounds = array<i64: 1, 64>}, {pipeline_mode = #tpu.pipeline_mode<synchronous>, transform_indices = @transform_13, window_bounds = array<i64: 1, 64>}, {pipeline_mode = #tpu.pipeline_mode<synchronous>, transform_indices = @transform_14, window_bounds = array<i64: 1, 64>}, {transform_indices = @transform_15, window_bounds = array<i64: 56, 64>}]} {
    %c0 = arith.constant 0 : index
    %c0_0 = arith.constant 0 : index
    %0 = vector.load %arg1[%c0, %c0_0] : memref<56x64xf32, #tpu.memory_space<vmem>>, vector<56x64xf32>
    %1 = vector.shape_cast %0 : vector<56x64xf32> to vector<1x56x64xf32>
    %2 = arith.truncf %1 : vector<1x56x64xf32> to vector<1x56x64xbf16>
    %c0_1 = arith.constant 0 : index
    %c0_2 = arith.constant 0 : index
    %3 = vector.load %arg4[%c0_1, %c0_2] : memref<64x56xbf16, #tpu.memory_space<vmem>>, vector<64x56xbf16>
    %4 = vector.shape_cast %3 : vector<64x56xbf16> to vector<1x64x56xbf16>
    "tpu.trace_start"() <{level = 10 : i32, message = "bfs,bsh->bfh"}> : () -> ()
    %cst = arith.constant dense<0.000000e+00> : vector<1x64x64xf32>
    %5 = tpu.matmul %4, %2, %cst {dimension_numbers = #tpu.dot_dimension_numbers<[2], [1], [1], [2], [0, 0, 0, 1, 1, 2], [0], [0]>} : vector<1x64x56xbf16>, vector<1x56x64xbf16>, vector<1x64x64xf32> -> vector<1x64x64xf32>
    "tpu.trace_stop"() : () -> ()
    %c0_3 = arith.constant 0 : index
    %c0_4 = arith.constant 0 : index
    %6 = vector.load %arg6[%c0_3, %c0_4] : memref<64x64xf32, #tpu.memory_space<vmem>>, vector<64x64xf32>
    %7 = vector.shape_cast %6 : vector<64x64xf32> to vector<1x64x64xf32>
    %8 = arith.mulf %5, %7 : vector<1x64x64xf32>
    %c0_5 = arith.constant 0 : index
    %c0_6 = arith.constant 0 : index
    %9 = vector.load %arg7[%c0_5, %c0_6] : memref<64x64xf32, #tpu.memory_space<vmem>>, vector<64x64xf32>
    %10 = vector.shape_cast %9 : vector<64x64xf32> to vector<1x64x64xf32>
    %11 = arith.mulf %5, %10 : vector<1x64x64xf32>
    %12 = tpu.concatenate %8, %11 in 1 : vector<1x64x64xf32>, vector<1x64x64xf32> -> vector<1x128x64xf32>
    %c0_7 = arith.constant 0 : index
    %c0_8 = arith.constant 0 : index
    %13 = vector.load %arg5[%c0_7, %c0_8] : memref<56x128xbf16, #tpu.memory_space<vmem>>, vector<56x128xbf16>
    %14 = vector.shape_cast %13 : vector<56x128xbf16> to vector<1x56x128xbf16>
    %15 = arith.truncf %12 : vector<1x128x64xf32> to vector<1x128x64xbf16>
    "tpu.trace_start"() <{level = 10 : i32, message = "bsf,bfh->bsh"}> : () -> ()
    %cst_9 = arith.constant dense<0.000000e+00> : vector<1x56x64xf32>
    %16 = tpu.matmul %14, %15, %cst_9 {dimension_numbers = #tpu.dot_dimension_numbers<[2], [1], [1], [2], [0, 0, 0, 1, 1, 2], [0], [0]>} : vector<1x56x128xbf16>, vector<1x128x64xbf16>, vector<1x56x64xf32> -> vector<1x56x64xf32>
    "tpu.trace_stop"() : () -> ()
    %17 = vector.shape_cast %16 : vector<1x56x64xf32> to vector<56x64xf32>
    %18 = arith.addf %17, %0 : vector<56x64xf32>
    %c0_10 = arith.constant 0 : index
    %c0_11 = arith.constant 0 : index
    %19 = vector.load %arg8[%c0_10, %c0_11] : memref<1x64xf32, #tpu.memory_space<vmem>>, vector<1x64xf32>
    %c0_12 = arith.constant 0 : index
    %c0_13 = arith.constant 0 : index
    %20 = vector.load %arg9[%c0_12, %c0_13] : memref<1x64xf32, #tpu.memory_space<vmem>>, vector<1x64xf32>
    %cst_14 = arith.constant dense<0.000000e+00> : vector<56xf32>
    %21 = vector.multi_reduction <add>, %18, %cst_14 [1] : vector<56x64xf32> to vector<56xf32>
    %22 = vector.shape_cast %21 : vector<56xf32> to vector<56x1xf32>
    %cst_15 = arith.constant 6.400000e+01 : f32
    %23 = vector.broadcast %cst_15 : f32 to vector<56x1xf32>
    %24 = arith.divf %22, %23 : vector<56x1xf32>
    %25 = vector.broadcast %24 : vector<56x1xf32> to vector<56x64xf32>
    %26 = arith.subf %18, %25 : vector<56x64xf32>
    %27 = arith.mulf %26, %26 : vector<56x64xf32>
    %cst_16 = arith.constant dense<0.000000e+00> : vector<56xf32>
    %28 = vector.multi_reduction <add>, %27, %cst_16 [1] : vector<56x64xf32> to vector<56xf32>
    %29 = vector.shape_cast %28 : vector<56xf32> to vector<56x1xf32>
    %cst_17 = arith.constant 6.400000e+01 : f32
    %30 = vector.broadcast %cst_17 : f32 to vector<56x1xf32>
    %31 = arith.divf %29, %30 : vector<56x1xf32>
    %32 = vector.broadcast %24 : vector<56x1xf32> to vector<56x64xf32>
    %33 = arith.subf %18, %32 : vector<56x64xf32>
    %cst_18 = arith.constant 9.99999996E-13 : f32
    %34 = vector.broadcast %cst_18 : f32 to vector<56x1xf32>
    %35 = arith.addf %31, %34 : vector<56x1xf32>
    %36 = math.rsqrt %35 : vector<56x1xf32>
    %37 = vector.broadcast %36 : vector<56x1xf32> to vector<56x64xf32>
    %38 = arith.mulf %33, %37 : vector<56x64xf32>
    %39 = vector.broadcast %19 : vector<1x64xf32> to vector<56x64xf32>
    %40 = arith.mulf %39, %38 : vector<56x64xf32>
    %41 = vector.broadcast %20 : vector<1x64xf32> to vector<56x64xf32>
    %42 = arith.addf %40, %41 : vector<56x64xf32>
    %43 = arith.truncf %42 : vector<56x64xf32> to vector<56x64xbf16>
    %c0_19 = arith.constant 0 : index
    %c0_20 = arith.constant 0 : index
    %44 = vector.load %arg10[%c0_19, %c0_20] : memref<64x256xbf16, #tpu.memory_space<vmem>>, vector<64x256xbf16>
    %cst_21 = arith.constant dense<0.000000e+00> : vector<56x256xf32>
    %45 = tpu.matmul %43, %44, %cst_21 {dimension_numbers = #tpu.dot_dimension_numbers<[1], [0], [0], [1], [0, 0, 1, 1], [], []>} : vector<56x64xbf16>, vector<64x256xbf16>, vector<56x256xf32> -> vector<56x256xf32>
    %c0_22 = arith.constant 0 : index
    %c0_23 = arith.constant 0 : index
    %46 = vector.load %arg11[%c0_22, %c0_23] : memref<1x256xf32, #tpu.memory_space<vmem>>, vector<1x256xf32>
    %47 = vector.broadcast %46 : vector<1x256xf32> to vector<56x256xf32>
    %48 = arith.addf %45, %47 : vector<56x256xf32>
    %cst_24 = arith.constant 5.000000e-01 : f32
    %49 = vector.broadcast %cst_24 : f32 to vector<56x256xf32>
    %50 = arith.mulf %49, %48 : vector<56x256xf32>
    %51 = arith.mulf %48, %48 : vector<56x256xf32>
    %52 = arith.mulf %51, %48 : vector<56x256xf32>
    %cst_25 = arith.constant 4.471500e-02 : f32
    %53 = vector.broadcast %cst_25 : f32 to vector<56x256xf32>
    %54 = arith.mulf %53, %52 : vector<56x256xf32>
    %55 = arith.addf %48, %54 : vector<56x256xf32>
    %cst_26 = arith.constant 0.797884583 : f32
    %56 = vector.broadcast %cst_26 : f32 to vector<56x256xf32>
    %57 = arith.mulf %56, %55 : vector<56x256xf32>
    %58 = math.tanh %57 : vector<56x256xf32>
    %cst_27 = arith.constant 1.000000e+00 : f32
    %59 = vector.broadcast %cst_27 : f32 to vector<56x256xf32>
    %60 = arith.addf %59, %58 : vector<56x256xf32>
    %61 = arith.mulf %50, %60 : vector<56x256xf32>
    %62 = arith.truncf %61 : vector<56x256xf32> to vector<56x256xbf16>
    %c0_28 = arith.constant 0 : index
    %c0_29 = arith.constant 0 : index
    %63 = vector.load %arg12[%c0_28, %c0_29] : memref<256x64xbf16, #tpu.memory_space<vmem>>, vector<256x64xbf16>
    %cst_30 = arith.constant dense<0.000000e+00> : vector<56x64xf32>
    %64 = tpu.matmul %62, %63, %cst_30 {dimension_numbers = #tpu.dot_dimension_numbers<[1], [0], [0], [1], [0, 0, 1, 1], [], []>} : vector<56x256xbf16>, vector<256x64xbf16>, vector<56x64xf32> -> vector<56x64xf32>
    %c0_31 = arith.constant 0 : index
    %c0_32 = arith.constant 0 : index
    %65 = vector.load %arg13[%c0_31, %c0_32] : memref<1x64xf32, #tpu.memory_space<vmem>>, vector<1x64xf32>
    %66 = vector.broadcast %65 : vector<1x64xf32> to vector<56x64xf32>
    %67 = arith.addf %64, %66 : vector<56x64xf32>
    %68 = arith.addf %67, %42 : vector<56x64xf32>
    %c0_33 = arith.constant 0 : index
    %c0_34 = arith.constant 0 : index
    %69 = vector.load %arg14[%c0_33, %c0_34] : memref<1x64xf32, #tpu.memory_space<vmem>>, vector<1x64xf32>
    %c0_35 = arith.constant 0 : index
    %c0_36 = arith.constant 0 : index
    %70 = vector.load %arg15[%c0_35, %c0_36] : memref<1x64xf32, #tpu.memory_space<vmem>>, vector<1x64xf32>
    %cst_37 = arith.constant dense<0.000000e+00> : vector<56xf32>
    %71 = vector.multi_reduction <add>, %68, %cst_37 [1] : vector<56x64xf32> to vector<56xf32>
    %72 = vector.shape_cast %71 : vector<56xf32> to vector<56x1xf32>
    %cst_38 = arith.constant 6.400000e+01 : f32
    %73 = vector.broadcast %cst_38 : f32 to vector<56x1xf32>
    %74 = arith.divf %72, %73 : vector<56x1xf32>
    %75 = vector.broadcast %74 : vector<56x1xf32> to vector<56x64xf32>
    %76 = arith.subf %68, %75 : vector<56x64xf32>
    %77 = arith.mulf %76, %76 : vector<56x64xf32>
    %cst_39 = arith.constant dense<0.000000e+00> : vector<56xf32>
    %78 = vector.multi_reduction <add>, %77, %cst_39 [1] : vector<56x64xf32> to vector<56xf32>
    %79 = vector.shape_cast %78 : vector<56xf32> to vector<56x1xf32>
    %cst_40 = arith.constant 6.400000e+01 : f32
    %80 = vector.broadcast %cst_40 : f32 to vector<56x1xf32>
    %81 = arith.divf %79, %80 : vector<56x1xf32>
    %82 = vector.broadcast %74 : vector<56x1xf32> to vector<56x64xf32>
    %83 = arith.subf %68, %82 : vector<56x64xf32>
    %cst_41 = arith.constant 9.99999996E-13 : f32
    %84 = vector.broadcast %cst_41 : f32 to vector<56x1xf32>
    %85 = arith.addf %81, %84 : vector<56x1xf32>
    %86 = math.rsqrt %85 : vector<56x1xf32>
    %87 = vector.broadcast %86 : vector<56x1xf32> to vector<56x64xf32>
    %88 = arith.mulf %83, %87 : vector<56x64xf32>
    %89 = vector.broadcast %69 : vector<1x64xf32> to vector<56x64xf32>
    %90 = arith.mulf %89, %88 : vector<56x64xf32>
    %91 = vector.broadcast %70 : vector<1x64xf32> to vector<56x64xf32>
    %92 = arith.addf %90, %91 : vector<56x64xf32>
    %c0_42 = arith.constant 0 : index
    %c0_43 = arith.constant 0 : index
    %93 = vector.load %arg2[%c0_42, %c0_43] : memref<56x64xf32, #tpu.memory_space<vmem>>, vector<56x64xf32>
    %94 = arith.addf %92, %93 : vector<56x64xf32>
    %c0_44 = arith.constant 0 : index
    %c0_45 = arith.constant 0 : index
    %95 = vector.load %arg3[%c0_44, %c0_45] : memref<56x1xf32, #tpu.memory_space<vmem>>, vector<56x1xf32>
    %96 = vector.broadcast %95 : vector<56x1xf32> to vector<56x64xf32>
    %97 = arith.mulf %94, %96 : vector<56x64xf32>
    %c0_46 = arith.constant 0 : index
    %c0_47 = arith.constant 0 : index
    %98 = vector.load %arg16[%c0_46, %c0_47] : memref<56x64xf32, #tpu.memory_space<vmem>>, vector<56x64xf32>
    tpu.vector_store %arg16[%c0_46, %c0_47], %97 {strides = array<i32>} : memref<56x64xf32, #tpu.memory_space<vmem>>, vector<56x64xf32>,
    return
  }
  func.func @transform_0(%arg0: i32) -> (i32, i32) {
    %c0_i32 = arith.constant 0 : i32
    %c0_i32_0 = arith.constant 0 : i32
    return %arg0, %c0_i32 : i32, i32
  }
  func.func @transform_1(%arg0: i32) -> (i32, i32) {
    %c0_i32 = arith.constant 0 : i32
    %c0_i32_0 = arith.constant 0 : i32
    return %arg0, %c0_i32 : i32, i32
  }
  func.func @transform_2(%arg0: i32) -> (i32, i32) {
    %c0_i32 = arith.constant 0 : i32
    %c0_i32_0 = arith.constant 0 : i32
    return %arg0, %c0_i32 : i32, i32
  }
  func.func @transform_3(%arg0: i32) -> (i32, i32) {
    %c0_i32 = arith.constant 0 : i32
    %c0_i32_0 = arith.constant 0 : i32
    %c0_i32_1 = arith.constant 0 : i32
    return %c0_i32, %c0_i32_0 : i32, i32
  }
  func.func @transform_4(%arg0: i32) -> (i32, i32) {
    %c0_i32 = arith.constant 0 : i32
    %c0_i32_0 = arith.constant 0 : i32
    %c0_i32_1 = arith.constant 0 : i32
    return %c0_i32, %c0_i32_0 : i32, i32
  }
  func.func @transform_5(%arg0: i32) -> (i32, i32) {
    %c0_i32 = arith.constant 0 : i32
    %c0_i32_0 = arith.constant 0 : i32
    %c0_i32_1 = arith.constant 0 : i32
    return %c0_i32, %c0_i32_0 : i32, i32
  }
  func.func @transform_6(%arg0: i32) -> (i32, i32) {
    %c0_i32 = arith.constant 0 : i32
    %c0_i32_0 = arith.constant 0 : i32
    %c0_i32_1 = arith.constant 0 : i32
    return %c0_i32, %c0_i32_0 : i32, i32
  }
  func.func @transform_7(%arg0: i32) -> (i32, i32) {
    %c0_i32 = arith.constant 0 : i32
    %c0_i32_0 = arith.constant 0 : i32
    %c0_i32_1 = arith.constant 0 : i32
    return %c0_i32, %c0_i32_0 : i32, i32
  }
  func.func @transform_8(%arg0: i32) -> (i32, i32) {
    %c0_i32 = arith.constant 0 : i32
    %c0_i32_0 = arith.constant 0 : i32
    %c0_i32_1 = arith.constant 0 : i32
    return %c0_i32, %c0_i32_0 : i32, i32
  }
  func.func @transform_9(%arg0: i32) -> (i32, i32) {
    %c0_i32 = arith.constant 0 : i32
    %c0_i32_0 = arith.constant 0 : i32
    %c0_i32_1 = arith.constant 0 : i32
    return %c0_i32, %c0_i32_0 : i32, i32
  }
  func.func @transform_10(%arg0: i32) -> (i32, i32) {
    %c0_i32 = arith.constant 0 : i32
    %c0_i32_0 = arith.constant 0 : i32
    %c0_i32_1 = arith.constant 0 : i32
    return %c0_i32, %c0_i32_0 : i32, i32
  }
  func.func @transform_11(%arg0: i32) -> (i32, i32) {
    %c0_i32 = arith.constant 0 : i32
    %c0_i32_0 = arith.constant 0 : i32
    %c0_i32_1 = arith.constant 0 : i32
    return %c0_i32, %c0_i32_0 : i32, i32
  }
  func.func @transform_12(%arg0: i32) -> (i32, i32) {
    %c0_i32 = arith.constant 0 : i32
    %c0_i32_0 = arith.constant 0 : i32
    %c0_i32_1 = arith.constant 0 : i32
    return %c0_i32, %c0_i32_0 : i32, i32
  }
  func.func @transform_13(%arg0: i32) -> (i32, i32) {
    %c0_i32 = arith.constant 0 : i32
    %c0_i32_0 = arith.constant 0 : i32
    %c0_i32_1 = arith.constant 0 : i32
    return %c0_i32, %c0_i32_0 : i32, i32
  }
  func.func @transform_14(%arg0: i32) -> (i32, i32) {
    %c0_i32 = arith.constant 0 : i32
    %c0_i32_0 = arith.constant 0 : i32
    %c0_i32_1 = arith.constant 0 : i32
    return %c0_i32, %c0_i32_0 : i32, i32
  }
  func.func @transform_15(%arg0: i32) -> (i32, i32) {
    %c0_i32 = arith.constant 0 : i32
    %c0_i32_0 = arith.constant 0 : i32
    return %arg0, %c0_i32 : i32, i32
  }
}

</mosaic_0001>

<bundles_post_ra>
// kernel: tpu_custom_call.1
= control target key start
LH: loop header
LB: loop body
LE: loop exit
PB: predicated region body
PF: predicated region fallthrough
CT: control target
= control target key end

     0   :  { %s2122_s18 = smov 0   ;;  %s2679_s0 = inlined_call_operand.vmem [shape: f32[112,64], index: 0, kind: input, shape index: {}]   ;;  %s2680_s1 = inlined_call_operand.vmem [shape: f32[112,64], index: 1, kind: input, shape index: {}]   ;;  %s2681_s2 = inlined_call_operand.vmem [shape: f32[112,1], index: 2, kind: input, shape index: {}]   ;;  %s2682_s3 = inlined_call_operand.vmem [shape: bf16[64,56], index: 3, kind: input, shape index: {}]   ;;  %s2683_s4 = inlined_call_operand.vmem [shape: bf16[56,128], index: 4, kind: input, shape index: {}]   ;;  %s2684_s5 = inlined_call_operand.vmem [shape: f32[64,64], index: 5, kind: input, shape index: {}]   ;;  %s2685_s6 = inlined_call_operand.vmem [shape: f32[64,64], index: 6, kind: input, shape index: {}]   ;;  %s2686_s7 = inlined_call_operand.vmem [shape: f32[1,64], index: 7, kind: input, shape index: {}]   ;;  %s2687_s8 = inlined_call_operand.vmem [shape: f32[1,64], index: 8, kind: input, shape index: {}]   ;;  %s2688_s9 = inlined_call_operand.vmem [shape: bf16[64,256], index: 9, kind: input, shape index: {}]   ;;  %s2689_s10 = inlined_call_operand.vmem [shape: f32[1,256], index: 10, kind: input, shape index: {}]   ;;  %s2690_s11 = inlined_call_operand.vmem [shape: bf16[256,64], index: 11, kind: input, shape index: {}]   ;;  %s2691_s12 = inlined_call_operand.vmem [shape: f32[1,64], index: 12, kind: input, shape index: {}]   ;;  %s2692_s13 = inlined_call_operand.vmem [shape: f32[1,64], index: 13, kind: input, shape index: {}]   ;;  %s2693_s14 = inlined_call_operand.vmem [shape: f32[1,64], index: 14, kind: input, shape index: {}]   ;;  %s2694_s15 = inlined_call_operand.vmem [shape: f32[112,64], index: 15, kind: output, shape index: {}]  }
   0x1 LB: > { %s1770_s19 = sadd.s32 4294967295, %s2038_s18   ;;  %p1774_p0 = scmp.ge.s32.totalorder %s2038_s18, 1  ;;  %s2038_s18 = sphi %s2122_s18, %s25_s18  }
   0x2   : > { %p460_p1 = scmp.lt.s32.totalorder %s2038_s18, 3 }
   0x4   : > { %p461_p2 = pnand %p1774_p0, %p460_p1 }
   0x5   : > { %s518_s20 = smul.u32 (!%p461_p2), 7, %s1770_s19 }
   0x6   : > { %464 = sbr.rel (%p461_p2) target bundleno = 1261 (0x4ed), region = 80 }
   0x7   : > { %p519_p3 = scmp.lt.s32.totalorder (!%p461_p2), %s518_s20, 13 }
   0xb   : > { %s2698_s20 = smov (!%p519_p3, %s518_s20), 13  ;;  %vm619_vm0 = vcmask 1043456   ;;  %v1919_v26 = vld [vmem:[%s2682_s3 + $0x10] sm:$0xff]  ;;  %v1917_v27 = vld [vmem:[%s2682_s3] sm:$0xff]  ;;  %vm606_vm1 = vcmask 457728   ;;  %v1920_v28 = vld [vmem:[%s2682_s3 + $0x18] sm:$0xff] }
   0xc   : > { %s2130_s21 = sshll.u32 %s2698_s20, 3  ;;  %v1918_v29 = vld [vmem:[%s2682_s3 + $0x8] sm:$0xff]  ;;  %v674_v36 = vld [vmem:[%s2685_s6 + $0x30] sm:$0xff]  ;;  %v672_v39 = vld [vmem:[%s2685_s6 + $0x20] sm:$0xff]  ;;  %vm807_vm2 = vcmask 523264  }
   0xd   : > { %s522_s24 = scalar_lea.vmem %s2679_s0, %s2130_s21  ;;  %v673_v37 = vld [vmem:[%s2685_s6 + $0x28] sm:$0xff]  ;;  %v675_v40 = vld [vmem:[%s2685_s6 + $0x38] sm:$0xff]  ;;  %v670_v42 = vld [vmem:[%s2685_s6 + $0x10] sm:$0xff]  ;;  %s2536_s30 = scalar_lea.vmem %s2681_s2, %s2130_s21 }
   0xe   : > { %v2136_v0 = vld [vmem:[%s522_s24 + $0x30] sm:$0xff]  ;;  %v2138_v1 = vld [vmem:[%s522_s24 + $0x20] sm:$0xff]  ;;  %v2140_v2 = vld [vmem:[%s522_s24 + $0x28] sm:$0xff]  ;;  %s2601_s22 = scalar_lea.vmem %s2680_s1, %s2130_s21  ;;  %s2620_s27 = scalar_lea.vmem %s2694_s15, %s2130_s21 }
   0xf   : > { %v556_v3 = vpack.c.bf16 %v2136_v0, %v2136_v0  ;;  %v554_v4 = vpack.c.bf16 %v2138_v1, %v2138_v1  ;;  %v555_v5 = vpack.c.bf16 %v2140_v2, %v2140_v2  ;;  %v2148_v6 = vld [vmem:[%s522_s24 + $0x10] sm:$0xff]  ;;  %v2150_v7 = vld [vmem:[%s522_s24 + $0x18] sm:$0xff]  ;;  %v2156_v13 = vld [vmem:[%s522_s24] sm:$0xff] }
  0x10   : > { %v552_v11 = vpack.c.bf16 %v2148_v6, %v2148_v6  ;;  %v553_v12 = vpack.c.bf16 %v2150_v7, %v2150_v7  ;;  %v2158_v15 = vld [vmem:[%s522_s24 + $0x8] sm:$0xff]  ;;  %v550_v17 = vpack.c.bf16 %v2156_v13, %v2156_v13  ;;  %v671_v44 = vld [vmem:[%s2685_s6 + $0x18] sm:$0xff]  ;;  %v668_v49 = vld [vmem:[%s2685_s6] sm:$0xff] }
  0x11   : > { %v598_v8 = vunpack.c.l.b16 %v556_v3  ;;  %v596_v9 = vunpack.c.l.b16 %v554_v4  ;;  %v597_v10 = vunpack.c.l.b16 %v555_v5  ;;  %v551_v21 = vpack.c.bf16 %v2158_v15, %v2158_v15  ;;  %v669_v50 = vld [vmem:[%s2685_s6 + $0x8] sm:$0xff]  ;;  %v659_v3 = vld [vmem:[%s2684_s5 + $0x38] sm:$0xff] }
  0x12   : > { %v594_v19 = vunpack.c.l.b16 %v552_v11  ;;  %v595_v20 = vunpack.c.l.b16 %v553_v12  ;;  %v592_v23 = vunpack.c.l.b16 %v550_v17 }
  0x13   : > { %v602_v14 = vpack.c.b16 %v598_v8, %v598_v8  ;;  %v601_v18 = vpack.c.b16 %v597_v10, %v596_v9  ;;  %v593_v24 = vunpack.c.l.b16 %v551_v21  ;;  %v658_v9 = vld [vmem:[%s2684_s5 + $0x30] sm:$0xff] }
  0x14   : > { %v600_v22 = vpack.c.b16 %v595_v20, %v594_v19  ;;  %v656_v19 = vld [vmem:[%s2684_s5 + $0x20] sm:$0xff] }
  0x15   : > { %v621_v16 = vsel %vm619_vm0, %v602_v14, 0  ;;  %v599_v25 = vpack.c.b16 %v593_v24, %v592_v23  ;;  %v654_v24 = vld [vmem:[%s2684_s5 + $0x10] sm:$0xff] }
  0x16   : > { %1948 = vmatpush.bf16.msra.mxu3 %v621_v16  ;;  %627 = vmatpush.bf16.msra.mxu0 %v621_v16  ;;  %v657_v16 = vld [vmem:[%s2684_s5 + $0x28] sm:$0xff] }
  0x1a   : > { %1949 = vmatpush.bf16.msra.mxu3 %v601_v18  ;;  %628 = vmatpush.bf16.msra.mxu0 %v601_v18 }
  0x1e   : > { %1950 = vmatpush.bf16.msra.mxu3 %v600_v22  ;;  %629 = vmatpush.bf16.msra.mxu0 %v600_v22 }
  0x22   : > { %1951 = vmatpush.bf16.msra.mxu3 %v599_v25  ;;  %630 = vmatpush.bf16.msra.mxu0 %v599_v25  ;;  %v655_v25 = vld [vmem:[%s2684_s5 + $0x18] sm:$0xff] }
  0x25   : > { %1797 = vmatmul.msk.bf16.vlgmr.msra.gmra.mxu3 %vm606_vm1, %v1919_v26  ;;  %1795 = vmatmul.msk.bf16.vlgmr.msra.gmra.mxu0 %vm606_vm1, %v1917_v27 }
  0x35   : > { %1798 = vmatmul.msk.bf16.gmra.mxu3 %vm606_vm1, %v1920_v28  ;;  %1796 = vmatmul.msk.bf16.gmra.mxu0 %vm606_vm1, %v1918_v29  ;;  %v652_v29 = vld [vmem:[%s2684_s5] sm:$0xff] }
  0xa2   : > { %v2176_v30 = vpop.f32.mrf.mxu0 }
  0xa3   : > { %v676_v58 = vmul.f32 %v668_v49, %v2176_v30 }
  0xa5   : > { %v699_v5 = vpack.c.bf16 %v676_v58, %v676_v58 }
  0xa7   : > { %v753_v18 = vunpack.c.l.b16 %v699_v5 }
  0xa8   : > { %v642_v31 = vpop.f32.mrf.mxu3 }
  0xa9   : > { %v680_v46 = vmul.f32 %v672_v39, %v642_v31  ;;  %v664_v26 = vmul.f32 %v656_v19, %v642_v31  ;;  %v660_v31 = vmul.f32 %v652_v29, %v2176_v30  ;;  %v1921_v30 = vld [vmem:[%s2683_s4] sm:$0xff] }
  0xaa   : > { %v2178_v32 = vpop.f32.mrf.mxu0 }
  0xab   : > { %v703_v55 = vpack.c.bf16 %v680_v46, %v680_v46  ;;  %v677_v59 = vmul.f32 %v669_v50, %v2178_v32  ;;  %v695_v39 = vpack.c.bf16 %v664_v26, %v664_v26 }
  0xad   : > { %v757_v4 = vunpack.c.l.b16 %v703_v55  ;;  %v700_v8 = vpack.c.bf16 %v677_v59, %v677_v59  ;;  %v1923_v55 = vld [vmem:[%s2683_s4 + $0x10] sm:$0xff] }
  0xaf   : > { %v754_v20 = vunpack.c.l.b16 %v700_v8 }
  0xb0   : > { %v644_v33 = vpop.f32.mrf.mxu3 }
  0xb1   : > { %v681_v41 = vmul.f32 %v673_v37, %v644_v33  ;;  %v665_v21 = vmul.f32 %v657_v16, %v644_v33  ;;  %v765_v28 = vpack.c.b16 %v754_v20, %v753_v18  ;;  %v653_v33 = vld [vmem:[%s2684_s5 + $0x8] sm:$0xff]  ;;  %v2040_v20 = vmov 64.0  }
  0xb2   : > { %v637_v34 = vpop.f32.mrf.mxu0  ;;  %1974 = vrcp.f32 %v2040_v20  ;;  %v1813_v20 = vld [vmem:[%s2688_s9] sm:$0xf] }
  0xb3   : > { %v704_v51 = vpack.c.bf16 %v681_v41, %v681_v41  ;;  %v678_v52 = vmul.f32 %v670_v42, %v637_v34  ;;  %v661_v41 = vmul.f32 %v653_v33, %v2178_v32  ;;  %v1922_v32 = vld [vmem:[%s2683_s4 + $0x8] sm:$0xff] }
  0xb5   : > { %v758_v60 = vunpack.c.l.b16 %v704_v51  ;;  %v701_v61 = vpack.c.bf16 %v678_v52, %v678_v52  ;;  %v692_v49 = vpack.c.bf16 %v661_v41, %v661_v41 }
  0xb7   : > { %v755_v10 = vunpack.c.l.b16 %v701_v61  ;;  %v767_v14 = vpack.c.b16 %v758_v60, %v757_v4  ;;  %v746_v52 = vunpack.c.l.b16 %v692_v49 }
  0xb8   : > { %v647_v35 = vpop.f32.mrf.mxu3 }
  0xb9   : > { %v682_v38 = vmul.f32 %v674_v36, %v647_v35  ;;  %v666_v17 = vmul.f32 %v658_v9, %v647_v35  ;;  %v696_v35 = vpack.c.bf16 %v665_v21, %v665_v21  ;;  %v662_v36 = vmul.f32 %v654_v24, %v637_v34  ;;  %v1975_v21 = vpop.eup %1974 }
  0xba   : > { %v639_v43 = vpop.f32.mrf.mxu0  ;;  %vm834_vm3 = vweird.f32 %v1975_v21 }
  0xbb   : > { %v705_v47 = vpack.c.bf16 %v682_v38, %v682_v38  ;;  %v679_v53 = vmul.f32 %v671_v44, %v639_v43  ;;  %v697_v27 = vpack.c.bf16 %v666_v17, %v666_v17  ;;  %v663_v37 = vmul.f32 %v655_v25, %v639_v43 }
  0xbc   : > { %v750_v42 = vunpack.c.l.b16 %v696_v35  ;;  %v693_v44 = vpack.c.bf16 %v662_v36, %v662_v36 }
  0xbd   : > { %v759_v56 = vunpack.c.l.b16 %v705_v47  ;;  %v702_v62 = vpack.c.bf16 %v679_v53, %v679_v53  ;;  %v749_v47 = vunpack.c.l.b16 %v695_v39 }
  0xbe   : > { %v747_v50 = vunpack.c.l.b16 %v693_v44  ;;  %v1837_v44 = vld [vmem:[%s2688_s9 + $0x30] sm:$0xf] }
  0xbf   : > { %v756_v11 = vunpack.c.l.b16 %v702_v62  ;;  %v763_v34 = vpack.c.b16 %v750_v42, %v749_v47 }
  0xc0   : > { %v649_v45 = vpop.f32.mrf.mxu3 }
  0xc1   : > { %v683_v48 = vmul.f32 %v675_v40, %v649_v45  ;;  %v667_v12 = vmul.f32 %v659_v3, %v649_v45  ;;  %v766_v23 = vpack.c.b16 %v756_v11, %v755_v10  ;;  %v751_v40 = vunpack.c.l.b16 %v697_v27 }
  0xc2   : > { %v694_v45 = vpack.c.bf16 %v663_v37, %v663_v37 }
  0xc3   : > { %v706_v54 = vpack.c.bf16 %v683_v48, %v683_v48  ;;  %v698_v22 = vpack.c.bf16 %v667_v12, %v667_v12  ;;  %v691_v48 = vpack.c.bf16 %v660_v31, %v660_v31 }
  0xc4   : > { %v748_v51 = vunpack.c.l.b16 %v694_v45  ;;  %v1931_v45 = vld [vmem:[%s2688_s9 + $0x34] sm:$0xf0] }
  0xc5   : > { %v760_v57 = vunpack.c.l.b16 %v706_v54  ;;  %v752_v38 = vunpack.c.l.b16 %v698_v22  ;;  %v745_v43 = vunpack.c.l.b16 %v691_v48  ;;  %v1838_v47 = vor.u32 %v1931_v45, %v1837_v44 }
  0xc6   : > { %v762_v53 = vpack.c.b16 %v748_v51, %v747_v50 }
  0xc7   : > { %v768_v63 = vpack.c.b16 %v760_v57, %v759_v56  ;;  %v764_v46 = vpack.c.b16 %v752_v38, %v751_v40  ;;  %v761_v54 = vpack.c.b16 %v746_v52, %v745_v43  ;;  %v690_v56 = vld [vmem:[%s2683_s4 + $0x18] sm:$0xf]  ;;  %1952 = vmatpush.bf16.msra.mxu2 %v1838_v47 }
  0xc8   : > { %v720_v57 = vunpack.c.l.b16 %v690_v56 }
  0xc9   : > { %777 = vmatpush.bf16.msra.mxu1 %v768_v63 }
  0xca   : > { %v724_v58 = vpack.c.b16 %v720_v57, %v720_v57 }
  0xcd   : > { %778 = vmatpush.bf16.msra.mxu1 %v767_v14 }
  0xd1   : > { %779 = vmatpush.bf16.msra.mxu1 %v766_v23 }
  0xd5   : > { %780 = vmatpush.bf16.msra.mxu1 %v765_v28 }
  0xd9   : > { %781 = vmatpush.bf16.msra.mxu1 %v764_v46 }
  0xdd   : > { %782 = vmatpush.bf16.msra.mxu1 %v763_v34 }
  0xe1   : > { %783 = vmatpush.bf16.msra.mxu1 %v762_v53 }
  0xe5   : > { %784 = vmatpush.bf16.msra.mxu1 %v761_v54 }
  0xe8   : > { %785 = vmatmul.bf16.vlgmr.msra.gmra.mxu1 %v1921_v30 }
  0xe9   : > { %1063 = vmatpush.bf16.msrb.mxu1 %v1838_v47 }
  0xf8   : > { %790 = vmatmul.bf16.gmra.mxu1 %v1922_v32 }
 0x108   : > { %795 = vmatmul.bf16.gmra.mxu1 %v1923_v55 }
 0x118   : > { %800 = vmatmul.bf16.gmra.mxu1 %v724_v58 }
 0x165   : > { %v786_v59 = vpop.f32.mrf.mxu1 }
 0x166   : > { %v787_v60 = vadd.f32 %v786_v59, %v2156_v13 }
 0x168   : > { %v808_v61 = vsel %vm807_vm2, %v787_v60, 0.0 }
 0x169   : > { %809 = vadd.xlane.f32.xlu0 %v808_v61 }
 0x16d   : > { %v788_v62 = vpop.f32.mrf.mxu1 }
 0x16e   : > { %v789_v63 = vadd.f32 %v788_v62, %v2158_v15  ;;  %v1930_v62 = vld [vmem:[%s2688_s9 + $0x34] sm:$0xf] }
 0x170   : > { %v811_v3 = vsel %vm807_vm2, %v789_v63, 0.0 }
 0x171   : > { %812 = vadd.xlane.f32.xlu0 %v811_v3 }
 0x175   : > { %v791_v4 = vpop.f32.mrf.mxu1 }
 0x176   : > { %v792_v5 = vadd.f32 %v791_v4, %v2148_v6  ;;  %v1829_v4 = vld [vmem:[%s2688_s9 + $0x20] sm:$0xf] }
 0x178   : > { %v814_v8 = vsel %vm807_vm2, %v792_v5, 0.0 }
 0x179   : > { %815 = vadd.xlane.f32.xlu1 %v814_v8 }
 0x17d   : > { %v793_v9 = vpop.f32.mrf.mxu1 }
 0x17e   : > { %v794_v10 = vadd.f32 %v793_v9, %v2150_v7  ;;  %v1928_v9 = vld [vmem:[%s2688_s9 + $0x24] sm:$0xf] }
 0x180   : > { %v817_v13 = vsel %vm807_vm2, %v794_v10, 0.0 }
 0x181   : > { %818 = vadd.xlane.f32.xlu1 %v817_v13 }
 0x185   : > { %v796_v11 = vpop.f32.mrf.mxu1 }
 0x186   : > { %v797_v12 = vadd.f32 %v796_v11, %v2138_v1  ;;  %v830_v1 = vmul.f32 64.0, %v1975_v21  ;;  %v1821_v11 = vld [vmem:[%s2688_s9 + $0x10] sm:$0xf] }
 0x188   : > { %v820_v15 = vsel %vm807_vm2, %v797_v12, 0.0  ;;  %v831_v22 = vsub.f32 1.0, %v830_v1  ;;  %v1925_v1 = vld [vmem:[%s2688_s9 + $0x4] sm:$0xf0] }
 0x189   : > { %821 = vadd.xlane.f32.xlu2 %v820_v15  ;;  %v1926_v15 = vld [vmem:[%s2688_s9 + $0x14] sm:$0xf] }
 0x18a   : > { %v832_v23 = vmul.f32 %v1975_v21, %v831_v22 }
 0x18c   : > { %v833_v24 = vadd.f32 %v1975_v21, %v832_v23  ;;  %v1814_v23 = vor.u32 %v1925_v1, %v1813_v20 }
 0x18d   : > { %v798_v14 = vpop.f32.mrf.mxu1 }
 0x18e   : > { %v799_v16 = vadd.f32 %v798_v14, %v2140_v2  ;;  %v2258_v25 = vsel %vm834_vm3, %v1975_v21, %v833_v24 }
 0x190   : > { %v823_v6 = vsel %vm807_vm2, %v799_v16, 0.0 }
 0x191   : > { %824 = vadd.xlane.f32.xlu2 %v823_v6 }
 0x195   : > { %v801_v17 = vpop.f32.mrf.mxu1 }
 0x196   : > { %v802_v18 = vadd.f32 %v801_v17, %v2136_v0 }
 0x198   : > { %v826_v7 = vsel %vm807_vm2, %v802_v18, 0.0 }
 0x199   : > { %827 = vadd.xlane.f32.xlu2 %v826_v7  ;;  %v1924_v7 = vld [vmem:[%s2688_s9 + $0x4] sm:$0xf] }
 0x19d   : > { %v803_v19 = vpop.f32.mrf.mxu1 }
 0x19e   : > { %v1815_v19 = vld [vmem:[%s2688_s9 + $0x8] sm:$0xf0] }
 0x19f   : > { %v1818_v21 = vor.u32 %v1924_v7, %v1815_v19 }
 0x1dc   : > { %v810_v2 = vpop.xlane.xlu0 %809 }
 0x1dd   : > { %v836_v26 = vmul.f32 %v2258_v25, %v810_v2 }
 0x1df   : > { %v2261_v27 = vsub.f32 %v787_v60, %v836_v26 }
 0x1e1   : > { %v850_v0 = vmul.f32 %v2261_v27, %v2261_v27 }
 0x1e3   : > { %v857_v28 = vsel %vm807_vm2, %v850_v0, 0.0 }
 0x1e4   : > { %858 = vadd.xlane.f32.xlu0 %v857_v28  ;;  %v813_v29 = vpop.xlane.xlu0 %812 }
 0x1e5   : > { %v837_v33 = vmul.f32 %v2258_v25, %v813_v29 }
 0x1e7   : > { %v2267_v35 = vsub.f32 %v789_v63, %v837_v33  ;;  %v1839_v63 = vld [vmem:[%s2688_s9 + $0x38] sm:$0xf0] }
 0x1e8   : > { %v1842_v3 = vor.u32 %v1930_v62, %v1839_v63 }
 0x1e9   : > { %v851_v36 = vmul.f32 %v2267_v35, %v2267_v35 }
 0x1ea   : > { %1091 = vmatpush.bf16.msrb.mxu3 %v1842_v3 }
 0x1eb   : > { %v860_v37 = vsel %vm807_vm2, %v851_v36, 0.0 }
 0x1ec   : > { %v816_v38 = vpop.xlane.xlu1 %815  ;;  %861 = vadd.xlane.f32.xlu1 %v860_v37 }
 0x1ed   : > { %v838_v39 = vmul.f32 %v2258_v25, %v816_v38 }
 0x1ef   : > { %v2273_v40 = vsub.f32 %v792_v5, %v838_v39  ;;  %v1929_v5 = vld [vmem:[%s2688_s9 + $0x24] sm:$0xf0] }
 0x1f0   : > { %v1830_v8 = vor.u32 %v1929_v5, %v1829_v4 }
 0x1f1   : > { %v852_v31 = vmul.f32 %v2273_v40, %v2273_v40 }
 0x1f2   : > { %1064 = vmatpush.bf16.msrb.mxu1 %v1830_v8  ;;  %1953 = vmatpush.bf16.msra.mxu2 %v1830_v8 }
 0x1f3   : > { %v863_v41 = vsel %vm807_vm2, %v852_v31, 0.0 }
 0x1f4   : > { %v819_v42 = vpop.xlane.xlu1 %818  ;;  %864 = vadd.xlane.f32.xlu0 %v863_v41 }
 0x1f5   : > { %v839_v46 = vmul.f32 %v2258_v25, %v819_v42 }
 0x1f7   : > { %v2285_v48 = vsub.f32 %v794_v10, %v839_v46  ;;  %v1831_v10 = vld [vmem:[%s2688_s9 + $0x28] sm:$0xf0] }
 0x1f8   : > { %v1834_v13 = vor.u32 %v1928_v9, %v1831_v10 }
 0x1f9   : > { %v853_v49 = vmul.f32 %v2285_v48, %v2285_v48 }
 0x1fa   : > { %1092 = vmatpush.bf16.msrb.mxu3 %v1834_v13 }
 0x1fb   : > { %v866_v50 = vsel %vm807_vm2, %v853_v49, 0.0 }
 0x1fc   : > { %v822_v51 = vpop.xlane.xlu2 %821  ;;  %867 = vadd.xlane.f32.xlu1 %v866_v50 }
 0x1fd   : > { %v840_v34 = vmul.f32 %v2258_v25, %v822_v51 }
 0x1ff   : > { %v2291_v43 = vsub.f32 %v797_v12, %v840_v34  ;;  %v1927_v12 = vld [vmem:[%s2688_s9 + $0x14] sm:$0xf0] }
 0x200   : > { %v1822_v14 = vor.u32 %v1927_v12, %v1821_v11 }
 0x201   : > { %v854_v52 = vmul.f32 %v2291_v43, %v2291_v43 }
 0x202   : > { %1065 = vmatpush.bf16.msrb.mxu1 %v1822_v14  ;;  %1954 = vmatpush.bf16.msra.mxu2 %v1822_v14 }
 0x203   : > { %v869_v53 = vsel %vm807_vm2, %v854_v52, 0.0 }
 0x204   : > { %870 = vadd.xlane.f32.xlu2 %v869_v53  ;;  %v825_v54 = vpop.xlane.xlu2 %824  ;;  %v2358_v53 = vld [vmem:[%s2686_s7] ss:$0 sm:$0xff] }
 0x205   : > { %v841_v30 = vmul.f32 %v2258_v25, %v825_v54 }
 0x206   : > { %1066 = vmatpush.bf16.msrb.mxu1 %v1814_v23  ;;  %1955 = vmatpush.bf16.msra.mxu2 %v1814_v23 }
 0x207   : > { %v2297_v32 = vsub.f32 %v799_v16, %v841_v30  ;;  %v1823_v16 = vld [vmem:[%s2688_s9 + $0x18] sm:$0xf0] }
 0x208   : > { %v1826_v6 = vor.u32 %v1926_v15, %v1823_v16 }
 0x209   : > { %v855_v55 = vmul.f32 %v2297_v32, %v2297_v32 }
 0x20a   : > { %1093 = vmatpush.bf16.msrb.mxu3 %v1826_v6 }
 0x20b   : > { %v872_v56 = vsel %vm807_vm2, %v855_v55, 0.0 }
 0x20c   : > { %v828_v57 = vpop.xlane.xlu2 %827  ;;  %873 = vadd.xlane.f32.xlu0 %v872_v56 }
 0x20d   : > { %v842_v58 = vmul.f32 %v2258_v25, %v828_v57 }
 0x20e   : > { %1094 = vmatpush.bf16.msrb.mxu3 %v1818_v21 }
 0x20f   : > { %v2303_v59 = vsub.f32 %v802_v18, %v842_v58 }
 0x211   : > { %v856_v60 = vmul.f32 %v2303_v59, %v2303_v59 }
 0x213   : > { %v875_v61 = vsel %vm807_vm2, %v856_v60, 0.0 }
 0x214   : > { %876 = vadd.xlane.f32.xlu1 %v875_v61 }
 0x257   : > { %v859_v17 = vpop.xlane.xlu0 %858 }
 0x258   : > { %v878_v18 = vmul.f32 %v859_v17, %v2258_v25 }
 0x25a   : > { %v885_v22 = vadd.f32 1e-12, %v878_v18 }
 0x25c   : > { %1976 = vrsqrt.f32 %v885_v22  ;;  %vm898_vm5 = vweird.f32 %v885_v22 }
 0x25f   : > { %v862_v24 = vpop.xlane.xlu1 %861 }
 0x260   : > { %v879_v2 = vmul.f32 %v862_v24, %v2258_v25 }
 0x262   : > { %v1977_v26 = vpop.eup %1976  ;;  %v886_v0 = vadd.f32 1e-12, %v879_v2 }
 0x263   : > { %v893_v28 = vmul.f32 %v1977_v26, %v885_v22  ;;  %vm899_vm4 = vweird.f32 %v1977_v26 }
 0x264   : > { %1978 = vrsqrt.f32 %v886_v0  ;;  %vm900_vm6 = vmor %vm898_vm5, %vm899_vm4  ;;  %vm908_vm8 = vweird.f32 %v886_v0 }
 0x265   : > { %v894_v29 = vmul.f32 %v1977_v26, %v893_v28 }
 0x267   : > { %v895_v33 = vmul.f32 0.5, %v894_v29  ;;  %v865_v36 = vpop.xlane.xlu0 %864 }
 0x268   : > { %v880_v37 = vmul.f32 %v865_v36, %v2258_v25 }
 0x269   : > { %v896_v38 = vsub.f32 1.5, %v895_v33 }
 0x26a   : > { %v1979_v39 = vpop.eup %1978  ;;  %v887_v31 = vadd.f32 1e-12, %v880_v37 }
 0x26b   : > { %v897_v41 = vmul.f32 %v1977_v26, %v896_v38  ;;  %v903_v42 = vmul.f32 %v1979_v39, %v886_v0  ;;  %vm909_vm7 = vweird.f32 %v1979_v39 }
 0x26c   : > { %1980 = vrsqrt.f32 %v887_v31  ;;  %vm910_vm9 = vmor %vm908_vm8, %vm909_vm7  ;;  %vm918_vm11 = vweird.f32 %v887_v31 }
 0x26d   : > { %v904_v44 = vmul.f32 %v1979_v39, %v903_v42  ;;  %v901_v45 = vsel %vm900_vm6, %v1977_v26, %v897_v41 }
 0x26e   : > { %v962_v34 = vmul.f32 %v901_v45, %v2261_v27  ;;  %v2365_v27 = vld [vmem:[%s2687_s8] ss:$0 sm:$0xff] }
 0x26f   : > { %v905_v46 = vmul.f32 0.5, %v904_v44  ;;  %v868_v47 = vpop.xlane.xlu1 %867 }
 0x270   : > { %v881_v49 = vmul.f32 %v868_v47, %v2258_v25  ;;  %v972_v58 = vmul.f32 %v2358_v53, %v962_v34 }
 0x271   : > { %v906_v50 = vsub.f32 1.5, %v905_v46 }
 0x272   : > { %v1981_v51 = vpop.eup %1980  ;;  %v888_v52 = vadd.f32 1e-12, %v881_v49  ;;  %v2370_v8 = vadd.f32 %v2365_v27, %v972_v58 }
 0x273   : > { %v907_v54 = vmul.f32 %v1979_v39, %v906_v50  ;;  %v913_v30 = vmul.f32 %v1981_v51, %v887_v31  ;;  %vm919_vm10 = vweird.f32 %v1981_v51 }
 0x274   : > { %1982 = vrsqrt.f32 %v888_v52  ;;  %vm920_vm12 = vmor %vm918_vm11, %vm919_vm10  ;;  %vm928_vm14 = vweird.f32 %v888_v52 }
 0x275   : > { %v911_v55 = vsel %vm910_vm9, %v1979_v39, %v907_v54  ;;  %v914_v56 = vmul.f32 %v1981_v51, %v913_v30 }
 0x276   : > { %v963_v57 = vmul.f32 %v911_v55, %v2267_v35 }
 0x277   : > { %v915_v60 = vmul.f32 0.5, %v914_v56  ;;  %v871_v61 = vpop.xlane.xlu2 %870 }
 0x278   : > { %v882_v62 = vmul.f32 %v871_v61, %v2258_v25  ;;  %v973_v63 = vmul.f32 %v2358_v53, %v963_v57 }
 0x279   : > { %v916_v3 = vsub.f32 1.5, %v915_v60 }
 0x27a   : > { %v1983_v4 = vpop.eup %1982  ;;  %v889_v5 = vadd.f32 1e-12, %v882_v62  ;;  %v2373_v35 = vadd.f32 %v2365_v27, %v973_v63  ;;  %v1939_v63 = vld [vmem:[%s2690_s11 + $0x38] sm:$0xff] }
 0x27b   : > { %v917_v9 = vmul.f32 %v1981_v51, %v916_v3  ;;  %v923_v10 = vmul.f32 %v1983_v4, %v888_v52  ;;  %vm929_vm13 = vweird.f32 %v1983_v4  ;;  %1381 = vmatpush.bf16.msrb.mxu0 %v1939_v63  ;;  %v1946_v3 = vld [vmem:[%s2690_s11 + $0x70] sm:$0xff] }
 0x27c   : > { %1984 = vrsqrt.f32 %v889_v5  ;;  %v989_v13 = vpack.c.bf16 %v2373_v35, %v2370_v8  ;;  %vm930_vm15 = vmor %vm928_vm14, %vm929_vm13  ;;  %vm938_vm1 = vweird.f32 %v889_v5 }
 0x27d   : > { %v924_v11 = vmul.f32 %v1983_v4, %v923_v10  ;;  %v921_v12 = vsel %vm920_vm12, %v1981_v51, %v917_v9  ;;  %v1935_v9 = vld [vmem:[%s2690_s11 + $0x18] sm:$0xff]  ;;  %v1944_v10 = vld [vmem:[%s2690_s11 + $0x60] sm:$0xff] }
 0x27e   : > { %1843 = vmatmul.msk.bf16.vlgmr.msrb.gmra.mxu1 %vm807_vm2, %v989_v13  ;;  %1847 = vmatmul.msk.bf16.vlgmr.msrb.gmra.mxu3 %vm807_vm2, %v989_v13  ;;  %v964_v18 = vmul.f32 %v921_v12, %v2273_v40  ;;  %v1934_v13 = vld [vmem:[%s2690_s11 + $0x10] sm:$0xff]  ;;  %v1933_v12 = vld [vmem:[%s2690_s11 + $0x8] sm:$0xff] }
 0x27f   : > { %v925_v15 = vmul.f32 0.5, %v924_v11  ;;  %v874_v14 = vpop.xlane.xlu0 %873  ;;  %v1943_v11 = vld [vmem:[%s2690_s11 + $0x58] sm:$0xff] }
 0x280   : > { %v883_v16 = vmul.f32 %v874_v14, %v2258_v25  ;;  %v974_v23 = vmul.f32 %v2358_v53, %v964_v18  ;;  %v1942_v14 = vld [vmem:[%s2690_s11 + $0x50] sm:$0xff] }
 0x281   : > { %v926_v6 = vsub.f32 1.5, %v925_v15  ;;  %v1001_v15 = vld [vmem:[%s2689_s10] sm:$0x3] }
 0x282   : > { %v1985_v17 = vpop.eup %1984  ;;  %v890_v7 = vadd.f32 1e-12, %v883_v16  ;;  %v2386_v33 = vadd.f32 %v2365_v27, %v974_v23  ;;  %v2460_v16 = vperm.slane %v1001_v15, 0 }
 0x283   : > { %v927_v19 = vmul.f32 %v1983_v4, %v926_v6  ;;  %v933_v20 = vmul.f32 %v1985_v17, %v889_v5  ;;  %vm939_vm0 = vweird.f32 %v1985_v17  ;;  %v1945_v5 = vld [vmem:[%s2690_s11 + $0x68] sm:$0xff]  ;;  %v1932_v6 = vld [vmem:[%s2690_s11] sm:$0xff] }
 0x284   : > { %1986 = vrsqrt.f32 %v890_v7  ;;  %vm940_vm3 = vmor %vm938_vm1, %vm939_vm0  ;;  %vm948_vm5 = vweird.f32 %v890_v7 }
 0x285   : > { %v931_v21 = vsel %vm930_vm15, %v1983_v4, %v927_v19  ;;  %v934_v1 = vmul.f32 %v1985_v17, %v933_v20  ;;  %v1936_v4 = vld [vmem:[%s2690_s11 + $0x20] sm:$0xff]  ;;  %v2469_v20 = vperm.slane %v1001_v15, 1 }
 0x286   : > { %v965_v22 = vmul.f32 %v931_v21, %v2285_v48  ;;  %v1940_v21 = vld [vmem:[%s2690_s11 + $0x40] sm:$0xff] }
 0x287   : > { %v935_v24 = vmul.f32 0.5, %v934_v1  ;;  %v877_v2 = vpop.xlane.xlu1 %876 }
 0x288   : > { %v884_v26 = vmul.f32 %v877_v2, %v2258_v25  ;;  %v975_v0 = vmul.f32 %v2358_v53, %v965_v22 }
 0x289   : > { %v936_v28 = vsub.f32 1.5, %v935_v24 }
 0x28a   : > { %v1987_v40 = vpop.eup %1986  ;;  %v891_v29 = vadd.f32 1e-12, %v884_v26  ;;  %v2389_v36 = vadd.f32 %v2365_v27, %v975_v0 }
 0x28b   : > { %v937_v37 = vmul.f32 %v1985_v17, %v936_v28  ;;  %v943_v48 = vmul.f32 %v1987_v40, %v890_v7  ;;  %vm949_vm4 = vweird.f32 %v1987_v40 }
 0x28c   : > { %1988 = vrsqrt.f32 %v891_v29  ;;  %v990_v38 = vpack.c.bf16 %v2389_v36, %v2386_v33  ;;  %vm950_vm6 = vmor %vm948_vm5, %vm949_vm4  ;;  %vm958_vm8 = vweird.f32 %v891_v29 }
 0x28d   : > { %v944_v39 = vmul.f32 %v1987_v40, %v943_v48  ;;  %v941_v31 = vsel %vm940_vm3, %v1985_v17, %v937_v37  ;;  %v1941_v17 = vld [vmem:[%s2690_s11 + $0x48] sm:$0xff] }
 0x28e   : > { %1844 = vmatmul.msk.bf16.gmra.mxu1 %vm807_vm2, %v990_v38  ;;  %1848 = vmatmul.msk.bf16.gmra.mxu3 %vm807_vm2, %v990_v38  ;;  %v966_v45 = vmul.f32 %v941_v31, %v2291_v43 }
 0x28f   : > { %v945_v41 = vmul.f32 0.5, %v944_v39 }
 0x290   : > { %v976_v34 = vmul.f32 %v2358_v53, %v966_v45 }
 0x291   : > { %v946_v42 = vsub.f32 1.5, %v945_v41 }
 0x292   : > { %v1989_v44 = vpop.eup %1988  ;;  %v2400_v55 = vadd.f32 %v2365_v27, %v976_v34 }
 0x293   : > { %v947_v46 = vmul.f32 %v1987_v40, %v946_v42  ;;  %v953_v47 = vmul.f32 %v1989_v44, %v891_v29  ;;  %vm959_vm7 = vweird.f32 %v1989_v44 }
 0x294   : > { %vm960_vm9 = vmor %vm958_vm8, %vm959_vm7 }
 0x295   : > { %v951_v49 = vsel %vm950_vm6, %v1987_v40, %v947_v46  ;;  %v954_v50 = vmul.f32 %v1989_v44, %v953_v47 }
 0x296   : > { %v967_v51 = vmul.f32 %v951_v49, %v2297_v32 }
 0x297   : > { %v955_v52 = vmul.f32 0.5, %v954_v50 }
 0x298   : > { %v977_v54 = vmul.f32 %v2358_v53, %v967_v51 }
 0x299   : > { %v956_v30 = vsub.f32 1.5, %v955_v52 }
 0x29a   : > { %v2403_v43 = vadd.f32 %v2365_v27, %v977_v54 }
 0x29b   : > { %v957_v56 = vmul.f32 %v1989_v44, %v956_v30 }
 0x29c   : > { %v991_v57 = vpack.c.bf16 %v2403_v43, %v2400_v55 }
 0x29d   : > { %v961_v32 = vsel %vm960_vm9, %v1989_v44, %v957_v56 }
 0x29e   : > { %1845 = vmatmul.msk.bf16.vlgmr.msra.gmra.mxu2 %vm807_vm2, %v991_v57  ;;  %1849 = vmatmul.msk.bf16.gmra.mxu3 %vm807_vm2, %v991_v57  ;;  %v968_v58 = vmul.f32 %v961_v32, %v2303_v59  ;;  %v1938_v59 = vld [vmem:[%s2690_s11 + $0x30] sm:$0xff] }
 0x29f   : > { %1382 = vmatpush.bf16.msrb.mxu0 %v1938_v59 }
 0x2a0   : > { %v978_v60 = vmul.f32 %v2358_v53, %v968_v58  ;;  %v1947_v53 = vld [vmem:[%s2690_s11 + $0x78] sm:$0xff] }
 0x2a1   : > { %1409 = vmatpush.bf16.msrb.mxu2 %v1947_v53 }
 0x2a2   : > { %v2412_v61 = vadd.f32 %v2365_v27, %v978_v60  ;;  %v1937_v27 = vld [vmem:[%s2690_s11 + $0x28] sm:$0xff] }
 0x2a3   : > { %1383 = vmatpush.bf16.msrb.mxu0 %v1937_v27 }
 0x2a4   : > { %v992_v62 = vpack.c.bf16 %v2412_v61, %v2412_v61 }
 0x2a5   : > { %1410 = vmatpush.bf16.msrb.mxu2 %v1946_v3 }
 0x2a7   : > { %1384 = vmatpush.bf16.msrb.mxu0 %v1936_v4 }
 0x2a9   : > { %1411 = vmatpush.bf16.msrb.mxu2 %v1945_v5 }
 0x2ab   : > { %1385 = vmatpush.bf16.msrb.mxu0 %v1935_v9 }
 0x2ad   : > { %1412 = vmatpush.bf16.msrb.mxu2 %v1944_v10 }
 0x2ae   : > { %1846 = vmatmul.msk.bf16.gmra.mxu2 %vm807_vm2, %v992_v62  ;;  %1850 = vmatmul.msk.bf16.gmra.mxu3 %vm807_vm2, %v992_v62 }
 0x2af   : > { %1386 = vmatpush.bf16.msrb.mxu0 %v1934_v13 }
 0x2b1   : > { %1413 = vmatpush.bf16.msrb.mxu2 %v1943_v11 }
 0x2b3   : > { %1387 = vmatpush.bf16.msrb.mxu0 %v1933_v12 }
 0x2b5   : > { %1414 = vmatpush.bf16.msrb.mxu2 %v1942_v14 }
 0x2b7   : > { %1388 = vmatpush.bf16.msrb.mxu0 %v1932_v6 }
 0x2b9   : > { %1415 = vmatpush.bf16.msrb.mxu2 %v1941_v17 }
 0x2bd   : > { %1416 = vmatpush.bf16.msrb.mxu2 %v1940_v21 }
 0x2fb   : > { %v1068_v18 = vpop.f32.mrf.mxu1 }
 0x2fc   : > { %v1069_v7 = vadd.f32 %v1068_v18, %v2460_v16 }
 0x2fe   : > { %v1129_v19 = vmul.f32 %v1069_v7, %v1069_v7  ;;  %v1115_v9 = vmul.f32 0.5, %v1069_v7 }
 0x300   : > { %v1143_v1 = vmul.f32 %v1129_v19, %v1069_v7 }
 0x301   : > { %v1096_v22 = vpop.f32.mrf.mxu3 }
 0x302   : > { %v1157_v23 = vmul.f32 0.044715, %v1143_v1  ;;  %v1097_v24 = vadd.f32 %v1096_v22, %v2469_v20 }
 0x303   : > { %v1070_v2 = vpop.f32.mrf.mxu1 }
 0x304   : > { %v1171_v26 = vadd.f32 %v1157_v23, %v1069_v7  ;;  %v1130_v0 = vmul.f32 %v1097_v24, %v1097_v24  ;;  %v1071_v28 = vadd.f32 %v1070_v2, %v2460_v16  ;;  %v1116_v7 = vmul.f32 0.5, %v1097_v24 }
 0x306   : > { %v1144_v40 = vmul.f32 %v1130_v0, %v1097_v24  ;;  %v1131_v29 = vmul.f32 %v1071_v28, %v1071_v28  ;;  %v1185_v37 = vmul.f32 0.7978846, %v1171_v26  ;;  %v1117_v10 = vmul.f32 0.5, %v1071_v28 }
 0x308   : > { %v1158_v48 = vmul.f32 0.044715, %v1144_v40  ;;  %v1145_v38 = vmul.f32 %v1131_v29, %v1071_v28  ;;  %1990 = vtanh.f32 %v1185_v37 }
 0x309   : > { %v1098_v39 = vpop.f32.mrf.mxu3 }
 0x30a   : > { %v1172_v31 = vadd.f32 %v1158_v48, %v1097_v24  ;;  %v1159_v41 = vmul.f32 0.044715, %v1145_v38  ;;  %v1099_v42 = vadd.f32 %v1098_v39, %v2469_v20 }
 0x30b   : > { %v1073_v44 = vpop.f32.mrf.mxu1 }
 0x30c   : > { %v1173_v45 = vadd.f32 %v1159_v41, %v1071_v28  ;;  %v1132_v46 = vmul.f32 %v1099_v42, %v1099_v42  ;;  %v2478_v47 = vadd.f32 %v1073_v44, %v2460_v16  ;;  %v1186_v49 = vmul.f32 0.7978846, %v1172_v31 }
 0x30d   : > { %v1118_v28 = vmul.f32 0.5, %v1099_v42 }
 0x30e   : > { %v1187_v50 = vmul.f32 0.7978846, %v1173_v45  ;;  %v1146_v51 = vmul.f32 %v1132_v46, %v1099_v42  ;;  %v1133_v34 = vmul.f32 %v2478_v47, %v2478_v47  ;;  %v1991_v56 = vpop.eup %1990 }
 0x30f   : > { %v1213_v27 = vadd.f32 1.0, %v1991_v56 }
 0x310   : > { %1992 = vtanh.f32 %v1187_v50  ;;  %v1160_v52 = vmul.f32 0.044715, %v1146_v51  ;;  %v1147_v54 = vmul.f32 %v1133_v34, %v2478_v47 }
 0x311   : > { %v1101_v30 = vpop.f32.mrf.mxu3  ;;  %1994 = vtanh.f32 %v1186_v49  ;;  %v1227_v17 = vmul.f32 %v1213_v27, %v1115_v9 }
 0x312   : > { %v1174_v57 = vadd.f32 %v1160_v52, %v1099_v42  ;;  %v1161_v32 = vmul.f32 0.044715, %v1147_v54  ;;  %v2484_v58 = vadd.f32 %v1101_v30, %v2469_v20 }
 0x313   : > { %v1075_v60 = vpop.f32.mrf.mxu1 }
 0x314   : > { %v1188_v62 = vmul.f32 0.7978846, %v1174_v57  ;;  %v1134_v63 = vmul.f32 %v2484_v58, %v2484_v58  ;;  %v1076_v59 = vadd.f32 %v1075_v60, %v2460_v16  ;;  %v1175_v53 = vadd.f32 %v1161_v32, %v2478_v47 }
 0x315   : > { %v1119_v57 = vmul.f32 0.5, %v2478_v47 }
 0x316   : > { %v1993_v3 = vpop.eup %1992  ;;  %1996 = vtanh.f32 %v1188_v62  ;;  %v1148_v4 = vmul.f32 %v1134_v63, %v2484_v58  ;;  %v1135_v5 = vmul.f32 %v1076_v59, %v1076_v59  ;;  %v1189_v14 = vmul.f32 0.7978846, %v1175_v53 }
 0x317   : > { %v1215_v13 = vadd.f32 1.0, %v1993_v3  ;;  %v1995_v11 = vpop.eup %1994  ;;  %v1121_v32 = vmul.f32 0.5, %v1076_v59 }
 0x318   : > { %v1162_v12 = vmul.f32 0.044715, %v1148_v4  ;;  %v1149_v15 = vmul.f32 %v1135_v5, %v1076_v59  ;;  %v1214_v23 = vadd.f32 1.0, %v1995_v11  ;;  %1998 = vtanh.f32 %v1189_v14 }
 0x319   : > { %v1103_v6 = vpop.f32.mrf.mxu3  ;;  %v1229_v18 = vmul.f32 %v1215_v13, %v1117_v10 }
 0x31a   : > { %v1163_v19 = vmul.f32 0.044715, %v1149_v15  ;;  %v1104_v21 = vadd.f32 %v1103_v6, %v2469_v20  ;;  %v1176_v1 = vadd.f32 %v1162_v12, %v2484_v58  ;;  %v1228_v38 = vmul.f32 %v1214_v23, %v1116_v7 }
 0x31b   : > { %v1241_v22 = vpack.c.bf16 %v1229_v18, %v1227_v17  ;;  %v1120_v6 = vmul.f32 0.5, %v2484_v58 }
 0x31c   : > { %v1997_v2 = vpop.eup %1996  ;;  %v1136_v26 = vmul.f32 %v1104_v21, %v1104_v21  ;;  %v1177_v0 = vadd.f32 %v1163_v19, %v1076_v59  ;;  %v1190_v48 = vmul.f32 0.7978846, %v1176_v1  ;;  %v1122_v17 = vmul.f32 0.5, %v1104_v21 }
 0x31d   : > { %1389 = vmatmul.bf16.vlgmr.msrb.gmra.mxu0 %v1241_v22  ;;  %v1216_v40 = vadd.f32 1.0, %v1997_v2 }
 0x31e   : > { %v1150_v29 = vmul.f32 %v1136_v26, %v1104_v21  ;;  %v1191_v37 = vmul.f32 0.7978846, %v1177_v0  ;;  %v1999_v46 = vpop.eup %1998 }
 0x31f   : > { %v1230_v39 = vmul.f32 %v1216_v40, %v1118_v28  ;;  %v1217_v52 = vadd.f32 1.0, %v1999_v46 }
 0x320   : > { %v1164_v31 = vmul.f32 0.044715, %v1150_v29  ;;  %2000 = vtanh.f32 %v1191_v37 }
 0x321   : > { %v1078_v41 = vpop.f32.mrf.mxu2  ;;  %v1106_v44 = vpop.f32.mrf.mxu3  ;;  %v1242_v45 = vpack.c.bf16 %v1230_v39, %v1228_v38  ;;  %2002 = vtanh.f32 %v1190_v48  ;;  %v1231_v4 = vmul.f32 %v1217_v52, %v1119_v57 }
 0x322   : > { %v2494_v49 = vadd.f32 %v1078_v41, %v2460_v16  ;;  %v2497_v50 = vadd.f32 %v1106_v44, %v2469_v20  ;;  %v1178_v24 = vadd.f32 %v1164_v31, %v1104_v21 }
 0x323   : > { %1417 = vmatmul.bf16.vlgmr.msrb.gmra.mxu2 %v1242_v45 }
 0x324   : > { %v1137_v42 = vmul.f32 %v2494_v49, %v2494_v49  ;;  %v1138_v51 = vmul.f32 %v2497_v50, %v2497_v50  ;;  %v1192_v34 = vmul.f32 0.7978846, %v1178_v24 }
 0x326   : > { %v2001_v54 = vpop.eup %2000  ;;  %v1151_v30 = vmul.f32 %v1137_v42, %v2494_v49  ;;  %v1152_v56 = vmul.f32 %v1138_v51, %v2497_v50  ;;  %2004 = vtanh.f32 %v1192_v34 }
 0x327   : > { %v1219_v60 = vadd.f32 1.0, %v2001_v54  ;;  %v2003_v62 = vpop.eup %2002 }
 0x328   : > { %v1165_v63 = vmul.f32 0.044715, %v1151_v30  ;;  %v1166_v53 = vmul.f32 0.044715, %v1152_v56  ;;  %v1218_v12 = vadd.f32 1.0, %v2003_v62 }
 0x329   : > { %v1080_v27 = vpop.f32.mrf.mxu2  ;;  %v1108_v3 = vpop.f32.mrf.mxu3  ;;  %v1233_v5 = vmul.f32 %v1219_v60, %v1121_v32  ;;  %v1123_v60 = vmul.f32 0.5, %v2494_v49 }
 0x32a   : > { %v1081_v9 = vadd.f32 %v1080_v27, %v2460_v16  ;;  %v1109_v10 = vadd.f32 %v1108_v3, %v2469_v20  ;;  %v1179_v13 = vadd.f32 %v1165_v63, %v2494_v49  ;;  %v1180_v15 = vadd.f32 %v1166_v53, %v2497_v50 }
 0x32b   : > { %v1243_v11 = vpack.c.bf16 %v1233_v5, %v1231_v4  ;;  %v1232_v23 = vmul.f32 %v1218_v12, %v1120_v6  ;;  %v1124_v27 = vmul.f32 0.5, %v2497_v50 }
 0x32c   : > { %v2005_v47 = vpop.eup %2004  ;;  %v1139_v59 = vmul.f32 %v1081_v9, %v1081_v9  ;;  %v1140_v14 = vmul.f32 %v1109_v10, %v1109_v10  ;;  %v1193_v19 = vmul.f32 0.7978846, %v1179_v13  ;;  %v1194_v26 = vmul.f32 0.7978846, %v1180_v15 }
 0x32d   : > { %1394 = vmatmul.bf16.gmra.mxu0 %v1243_v11  ;;  %v1220_v18 = vadd.f32 1.0, %v2005_v47  ;;  %v1125_v62 = vmul.f32 0.5, %v1081_v9  ;;  %v1126_v3 = vmul.f32 0.5, %v1109_v10 }
 0x32e   : > { %v1153_v1 = vmul.f32 %v1139_v59, %v1081_v9  ;;  %v1154_v22 = vmul.f32 %v1140_v14, %v1109_v10  ;;  %2006 = vtanh.f32 %v1193_v19 }
 0x32f   : > { %v1234_v2 = vmul.f32 %v1220_v18, %v1122_v17  ;;  %2008 = vtanh.f32 %v1194_v26 }
 0x330   : > { %v1167_v0 = vmul.f32 0.044715, %v1153_v1  ;;  %v1168_v7 = vmul.f32 0.044715, %v1154_v22  ;;  %v1971_v22 = vld [vmem:[%s2691_s12] ss:$0 sm:$0xff] }
 0x331   : > { %v1083_v28 = vpop.f32.mrf.mxu2  ;;  %v1111_v40 = vpop.f32.mrf.mxu3  ;;  %v1244_v29 = vpack.c.bf16 %v1234_v2, %v1232_v23 }
 0x332   : > { %v1084_v37 = vadd.f32 %v1083_v28, %v2460_v16  ;;  %v1112_v48 = vadd.f32 %v1111_v40, %v2469_v20  ;;  %v1181_v38 = vadd.f32 %v1167_v0, %v1081_v9  ;;  %v1182_v58 = vadd.f32 %v1168_v7, %v1109_v10 }
 0x333   : > { %1422 = vmatmul.bf16.gmra.mxu2 %v1244_v29 }
 0x334   : > { %v1141_v21 = vmul.f32 %v1084_v37, %v1084_v37  ;;  %v1142_v39 = vmul.f32 %v1112_v48, %v1112_v48  ;;  %v1195_v31 = vmul.f32 0.7978846, %v1181_v38  ;;  %v1196_v41 = vmul.f32 0.7978846, %v1182_v58  ;;  %v2007_v46 = vpop.eup %2006 }
 0x335   : > { %v2009_v51 = vpop.eup %2008  ;;  %v1221_v54 = vadd.f32 1.0, %v2007_v46  ;;  %v1127_v6 = vmul.f32 0.5, %v1084_v37  ;;  %v1128_v17 = vmul.f32 0.5, %v1112_v48 }
 0x336   : > { %v1155_v44 = vmul.f32 %v1141_v21, %v1084_v37  ;;  %v1156_v45 = vmul.f32 %v1142_v39, %v1112_v48  ;;  %2010 = vtanh.f32 %v1195_v31  ;;  %v1222_v56 = vadd.f32 1.0, %v2009_v51 }
 0x337   : > { %2012 = vtanh.f32 %v1196_v41  ;;  %v1235_v5 = vmul.f32 %v1221_v54, %v1123_v60  ;;  %v2041_v51 = vmov 0  }
 0x338   : > { %v1169_v24 = vmul.f32 0.044715, %v1155_v44  ;;  %v1170_v42 = vmul.f32 0.044715, %v1156_v45  ;;  %v1236_v11 = vmul.f32 %v1222_v56, %v1124_v27  ;;  %1966 = vset.pattern.permute.xlu1 %v2041_v51  ;;  %1967 = vset.pattern.permute.xlu2 %v2041_v51 }
 0x339   : > { %v1085_v34 = vpop.f32.mrf.mxu2  ;;  %v1113_v16 = vpop.f32.mrf.mxu3  ;;  %1968 = vset.pattern.permute.xlu0 %v2041_v51  ;;  %v1639_v51 = vld [vmem:[%s2536_s30 + $0x28] sm:$0xff] }
 0x33a   : > { %v1183_v52 = vadd.f32 %v1169_v24, %v1084_v37  ;;  %v1184_v20 = vadd.f32 %v1170_v42, %v1112_v48 }
 0x33c   : > { %v2011_v30 = vpop.eup %2010  ;;  %v1197_v57 = vmul.f32 0.7978846, %v1183_v52  ;;  %v1198_v53 = vmul.f32 0.7978846, %v1184_v20 }
 0x33d   : > { %v2013_v32 = vpop.eup %2012  ;;  %v1223_v63 = vadd.f32 1.0, %v2011_v30 }
 0x33e   : > { %v1224_v4 = vadd.f32 1.0, %v2013_v32  ;;  %2014 = vtanh.f32 %v1197_v57 }
 0x33f   : > { %v1237_v13 = vmul.f32 %v1223_v63, %v1125_v62  ;;  %2016 = vtanh.f32 %v1198_v53 }
 0x340   : > { %v1238_v12 = vmul.f32 %v1224_v4, %v1126_v3 }
 0x341   : > { %v1245_v15 = vpack.c.bf16 %v1237_v13, %v1235_v5  ;;  %v1635_v13 = vld [vmem:[%s2536_s30 + $0x8] sm:$0xff] }
 0x342   : > { %v1246_v47 = vpack.c.bf16 %v1238_v12, %v1236_v11 }
 0x343   : > { %1399 = vmatmul.bf16.gmra.mxu0 %v1245_v15 }
 0x344   : > { %1427 = vmatmul.bf16.gmra.mxu2 %v1246_v47  ;;  %v2015_v59 = vpop.eup %2014 }
 0x345   : > { %v2017_v14 = vpop.eup %2016  ;;  %v1225_v49 = vadd.f32 1.0, %v2015_v59 }
 0x346   : > { %v1226_v9 = vadd.f32 1.0, %v2017_v14 }
 0x347   : > { %v1239_v18 = vmul.f32 %v1225_v49, %v1127_v6 }
 0x348   : > { %v1240_v50 = vmul.f32 %v1226_v9, %v1128_v17 }
 0x349   : > { %v1247_v10 = vpack.c.bf16 %v1239_v18, %v1239_v18 }
 0x34a   : > { %v1248_v19 = vpack.c.bf16 %v1240_v50, %v1240_v50 }
 0x353   : > { %1404 = vmatmul.bf16.gmra.mxu0 %v1247_v10 }
 0x354   : > { %1432 = vmatmul.bf16.gmra.mxu2 %v1248_v19 }
 0x39a   : > { %v1390_v1 = vpop.f32.mrf.mxu0 }
 0x39b   : > { %v1391_v2 = vadd.f32 %v1971_v22, %v1390_v1 }
 0x3a2   : > { %v1392_v23 = vpop.f32.mrf.mxu0 }
 0x3a3   : > { %v1393_v40 = vadd.f32 %v1971_v22, %v1392_v23 }
 0x3a6   : > { %v1418_v26 = vpop.f32.mrf.mxu2 }
 0x3a7   : > { %v1419_v0 = vadd.f32 %v1418_v26, %v1391_v2 }
 0x3a9   : > { %v1437_v7 = vadd.f32 %v1419_v0, %v2370_v8 }
 0x3aa   : > { %v1395_v29 = vpop.f32.mrf.mxu0 }
 0x3ab   : > { %v1446_v28 = vsel %vm807_vm2, %v1437_v7, 0.0  ;;  %v1396_v21 = vadd.f32 %v1971_v22, %v1395_v29 }
 0x3ac   : > { %1447 = vadd.xlane.f32.xlu2 %v1446_v28 }
 0x3ae   : > { %v1420_v37 = vpop.f32.mrf.mxu2 }
 0x3af   : > { %v1421_v48 = vadd.f32 %v1420_v37, %v1393_v40 }
 0x3b1   : > { %v1438_v38 = vadd.f32 %v1421_v48, %v2373_v35 }
 0x3b2   : > { %v1397_v41 = vpop.f32.mrf.mxu0 }
 0x3b3   : > { %v1449_v58 = vsel %vm807_vm2, %v1438_v38, 0.0  ;;  %v1398_v45 = vadd.f32 %v1971_v22, %v1397_v41 }
 0x3b4   : > { %1450 = vadd.xlane.f32.xlu0 %v1449_v58 }
 0x3b6   : > { %v1423_v39 = vpop.f32.mrf.mxu2 }
 0x3b7   : > { %v1424_v31 = vadd.f32 %v1423_v39, %v1396_v21 }
 0x3b9   : > { %v1439_v44 = vadd.f32 %v1424_v31, %v2386_v33 }
 0x3bb   : > { %v1452_v8 = vsel %vm807_vm2, %v1439_v44, 0.0 }
 0x3bc   : > { %1453 = vadd.xlane.f32.xlu1 %v1452_v8 }
 0x3be   : > { %v1425_v46 = vpop.f32.mrf.mxu2 }
 0x3bf   : > { %v1426_v24 = vadd.f32 %v1425_v46, %v1398_v45  ;;  %v1638_v45 = vld [vmem:[%s2536_s30 + $0x20] sm:$0xff]  ;;  %v1637_v46 = vld [vmem:[%s2536_s30 + $0x18] sm:$0xff] }
 0x3c0   : > { %v1400_v42 = vpop.f32.mrf.mxu0 }
 0x3c1   : > { %v1440_v35 = vadd.f32 %v1426_v24, %v2389_v36  ;;  %v1401_v16 = vadd.f32 %v1971_v22, %v1400_v42  ;;  %v1640_v24 = vld [vmem:[%s2536_s30 + $0x30] sm:$0xff] }
 0x3c2   : > { %v1636_v42 = vld [vmem:[%s2536_s30 + $0x10] sm:$0xff] }
 0x3c3   : > { %v1455_v34 = vsel %vm807_vm2, %v1440_v35, 0.0 }
 0x3c4   : > { %1456 = vadd.xlane.f32.xlu2 %v1455_v34 }
 0x3c7   : > { %v1428_v52 = vpop.f32.mrf.mxu2 }
 0x3c8   : > { %v1429_v20 = vadd.f32 %v1428_v52, %v1401_v16  ;;  %v1402_v33 = vpop.f32.mrf.mxu0 }
 0x3c9   : > { %v1403_v56 = vadd.f32 %v1971_v22, %v1402_v33 }
 0x3ca   : > { %v1441_v54 = vadd.f32 %v1429_v20, %v2400_v55 }
 0x3cc   : > { %v1458_v30 = vsel %vm807_vm2, %v1441_v54, 0.0 }
 0x3cd   : > { %1459 = vadd.xlane.f32.xlu0 %v1458_v30 }
 0x3cf   : > { %v1430_v57 = vpop.f32.mrf.mxu2 }
 0x3d0   : > { %v1431_v32 = vadd.f32 %v1430_v57, %v1403_v56  ;;  %v1405_v60 = vpop.f32.mrf.mxu0 }
 0x3d1   : > { %v1406_v63 = vadd.f32 %v1971_v22, %v1405_v60 }
 0x3d2   : > { %v1442_v36 = vadd.f32 %v1431_v32, %v2403_v43  ;;  %v1634_v43 = vld [vmem:[%s2536_s30] sm:$0xff] }
 0x3d4   : > { %v1461_v62 = vsel %vm807_vm2, %v1442_v36, 0.0 }
 0x3d5   : > { %1462 = vadd.xlane.f32.xlu1 %v1461_v62 }
 0x3d7   : > { %v1433_v53 = vpop.f32.mrf.mxu2 }
 0x3d8   : > { %v1434_v27 = vadd.f32 %v1433_v53, %v1406_v63  ;;  %v1407_v3 = vpop.f32.mrf.mxu0 }
 0x3da   : > { %v1443_v4 = vadd.f32 %v1434_v27, %v2412_v61 }
 0x3dc   : > { %v1464_v55 = vsel %vm807_vm2, %v1443_v4, 0.0 }
 0x3dd   : > { %1465 = vadd.xlane.f32.xlu2 %v1464_v55  ;;  %v2595_v55 = vld [vmem:[%s2692_s13] ss:$0 sm:$0xff] }
 0x3df   : > { %v1435_v5 = vpop.f32.mrf.mxu2 }
 0x3ee   : > { %1643 = vperm.xlu1 %1966, %v1634_v43  }
 0x3f5   : > { %1648 = vperm.xlu2 %1967, %v1635_v13   ;;  %v2606_v13 = vld [vmem:[%s2693_s14] ss:$0 sm:$0xff] }
 0x41f   : > { %v1448_v11 = vpop.xlane.xlu2 %1447 }
 0x420   : > { %v1467_v12 = vmul.f32 %v1448_v11, %v2258_v25 }
 0x422   : > { %v2541_v15 = vsub.f32 %v1437_v7, %v1467_v12 }
 0x424   : > { %v1481_v61 = vmul.f32 %v2541_v15, %v2541_v15 }
 0x426   : > { %v1488_v47 = vsel %vm807_vm2, %v1481_v61, 0.0 }
 0x427   : > { %v1451_v59 = vpop.xlane.xlu0 %1450  ;;  %1489 = vadd.xlane.f32.xlu0 %v1488_v47 }
 0x428   : > { %v1468_v14 = vmul.f32 %v1451_v59, %v2258_v25 }
 0x42a   : > { %v2547_v49 = vsub.f32 %v1438_v38, %v1468_v14  ;;  %v1620_v14 = vld [vmem:[%s2601_s22] sm:$0xff] }
 0x42c   : > { %v1482_v9 = vmul.f32 %v2547_v49, %v2547_v49 }
 0x42e   : > { %v1491_v6 = vsel %vm807_vm2, %v1482_v9, 0.0 }
 0x42f   : > { %v1454_v17 = vpop.xlane.xlu1 %1453  ;;  %1492 = vadd.xlane.f32.xlu1 %v1491_v6 }
 0x430   : > { %v1469_v18 = vmul.f32 %v1454_v17, %v2258_v25 }
 0x432   : > { %v2553_v50 = vsub.f32 %v1439_v44, %v1469_v18 }
 0x434   : > { %v1483_v10 = vmul.f32 %v2553_v50, %v2553_v50 }
 0x436   : > { %v1494_v19 = vsel %vm807_vm2, %v1483_v10, 0.0 }
 0x437   : > { %v1457_v1 = vpop.xlane.xlu2 %1456  ;;  %1495 = vadd.xlane.f32.xlu2 %v1494_v19 }
 0x438   : > { %v1470_v22 = vmul.f32 %v1457_v1, %v2258_v25 }
 0x43a   : > { %v2559_v23 = vsub.f32 %v1440_v35, %v1470_v22 }
 0x43c   : > { %v1484_v2 = vmul.f32 %v2559_v23, %v2559_v23 }
 0x43e   : > { %v1497_v26 = vsel %vm807_vm2, %v1484_v2, 0.0 }
 0x43f   : > { %1498 = vadd.xlane.f32.xlu0 %v1497_v26 }
 0x440   : > { %v1460_v0 = vpop.xlane.xlu0 %1459 }
 0x441   : > { %v1471_v7 = vmul.f32 %v1460_v0, %v2258_v25 }
 0x443   : > { %v2565_v28 = vsub.f32 %v1441_v54, %v1471_v7  ;;  %v1621_v7 = vld [vmem:[%s2601_s22 + $0x8] sm:$0xff] }
 0x445   : > { %v1485_v40 = vmul.f32 %v2565_v28, %v2565_v28 }
 0x447   : > { %v1500_v29 = vsel %vm807_vm2, %v1485_v40, 0.0 }
 0x448   : > { %v1463_v37 = vpop.xlane.xlu1 %1462  ;;  %1501 = vadd.xlane.f32.xlu1 %v1500_v29 }
 0x449   : > { %v1472_v48 = vmul.f32 %v1463_v37, %v2258_v25 }
 0x44b   : > { %v2571_v38 = vsub.f32 %v1442_v36, %v1472_v48 }
 0x44d   : > { %v1486_v58 = vmul.f32 %v2571_v38, %v2571_v38 }
 0x44f   : > { %v1503_v21 = vsel %vm807_vm2, %v1486_v58, 0.0 }
 0x450   : > { %v1466_v39 = vpop.xlane.xlu2 %1465  ;;  %1504 = vadd.xlane.f32.xlu2 %v1503_v21 }
 0x451   : > { %v1473_v31 = vmul.f32 %v1466_v39, %v2258_v25 }
 0x453   : > { %v2577_v41 = vsub.f32 %v1443_v4, %v1473_v31 }
 0x455   : > { %v1487_v44 = vmul.f32 %v2577_v41, %v2577_v41 }
 0x457   : > { %v1506_v8 = vsel %vm807_vm2, %v1487_v44, 0.0 }
 0x458   : > { %1507 = vadd.xlane.f32.xlu0 %v1506_v8  ;;  %v1649_v20 = vpop.permute.xlu2 %1648 }
 0x460   : > { %v1644_v35 = vpop.permute.xlu1 %1643 }
 0x461   : > { %1663 = vperm.xlu1 %1966, %v1638_v45  }
 0x468   : > { %1658 = vperm.xlu2 %1967, %v1637_v46  }
 0x469   : > { %1673 = vperm.xlu1 %1966, %v1640_v24  }
 0x46c   : > { %1653 = vperm.xlu0 %1968, %v1636_v42  }
 0x470   : > { %1668 = vperm.xlu2 %1967, %v1639_v51  }
 0x49a   : > { %v1490_v34 = vpop.xlane.xlu0 %1489 }
 0x49b   : > { %v1509_v16 = vmul.f32 %v1490_v34, %v2258_v25 }
 0x49d   : > { %v1516_v52 = vadd.f32 1e-12, %v1509_v16 }
 0x49f   : > { %2018 = vrsqrt.f32 %v1516_v52  ;;  %vm1529_vm11 = vweird.f32 %v1516_v52 }
 0x4a2   : > { %v1493_v33 = vpop.xlane.xlu1 %1492 }
 0x4a3   : > { %v1510_v54 = vmul.f32 %v1493_v33, %v2258_v25 }
 0x4a5   : > { %v2019_v30 = vpop.eup %2018  ;;  %v1517_v56 = vadd.f32 1e-12, %v1510_v54 }
 0x4a6   : > { %v1524_v57 = vmul.f32 %v2019_v30, %v1516_v52  ;;  %vm1530_vm10 = vweird.f32 %v2019_v30 }
 0x4a7   : > { %2020 = vrsqrt.f32 %v1517_v56  ;;  %vm1531_vm12 = vmor %vm1529_vm11, %vm1530_vm10  ;;  %vm1539_vm14 = vweird.f32 %v1517_v56 }
 0x4a8   : > { %v1525_v32 = vmul.f32 %v2019_v30, %v1524_v57 }
 0x4aa   : > { %v1526_v60 = vmul.f32 0.5, %v1525_v32  ;;  %v1496_v36 = vpop.xlane.xlu2 %1495  ;;  %v1623_v32 = vld [vmem:[%s2601_s22 + $0x18] sm:$0xff] }
 0x4ab   : > { %v1511_v62 = vmul.f32 %v1496_v36, %v2258_v25 }
 0x4ac   : > { %v1527_v63 = vsub.f32 1.5, %v1526_v60 }
 0x4ad   : > { %v2021_v53 = vpop.eup %2020  ;;  %v2590_v27 = vadd.f32 1e-12, %v1511_v62 }
 0x4ae   : > { %v1528_v3 = vmul.f32 %v2019_v30, %v1527_v63  ;;  %v1534_v4 = vmul.f32 %v2021_v53, %v1517_v56  ;;  %vm1540_vm13 = vweird.f32 %v2021_v53 }
 0x4af   : > { %2022 = vrsqrt.f32 %v2590_v27  ;;  %vm1541_vm15 = vmor %vm1539_vm14, %vm1540_vm13  ;;  %vm1549_vm5 = vweird.f32 %v2590_v27 }
 0x4b0   : > { %v1532_v5 = vsel %vm1531_vm12, %v2019_v30, %v1528_v3  ;;  %v1535_v43 = vmul.f32 %v2021_v53, %v1534_v4 }
 0x4b1   : > { %v1593_v11 = vmul.f32 %v1532_v5, %v2541_v15 }
 0x4b2   : > { %v1536_v12 = vmul.f32 0.5, %v1535_v43  ;;  %v1499_v61 = vpop.xlane.xlu0 %1498 }
 0x4b3   : > { %v1603_v47 = vmul.f32 %v2595_v55, %v1593_v11  ;;  %v1512_v59 = vmul.f32 %v1499_v61, %v2258_v25 }
 0x4b4   : > { %v1537_v9 = vsub.f32 1.5, %v1536_v12 }
 0x4b5   : > { %v1613_v6 = vadd.f32 %v2606_v13, %v1603_v47  ;;  %v1519_v17 = vadd.f32 1e-12, %v1512_v59  ;;  %v2614_v10 = vpop.eup %2022 }
 0x4b6   : > { %v1538_v18 = vmul.f32 %v2021_v53, %v1537_v9  ;;  %v1544_v2 = vmul.f32 %v2614_v10, %v2590_v27  ;;  %vm1550_vm4 = vweird.f32 %v2614_v10 }
 0x4b7   : > { %v1627_v15 = vadd.f32 %v1620_v14, %v1613_v6  ;;  %2024 = vrsqrt.f32 %v1519_v17  ;;  %vm1559_vm1 = vweird.f32 %v1519_v17  ;;  %vm2642_vm6 = vmor %vm1549_vm5, %vm1550_vm4  ;;  %v1624_v6 = vld [vmem:[%s2601_s22 + $0x20] sm:$0xff] }
 0x4b8   : > { %v1542_v19 = vsel %vm1541_vm15, %v2021_v53, %v1538_v18  ;;  %v1545_v48 = vmul.f32 %v2614_v10, %v1544_v2 }
 0x4b9   : > { %v1676_v1 = vmul.f32 %v1644_v35, %v1627_v15  ;;  %v1594_v22 = vmul.f32 %v1542_v19, %v2547_v49 }
 0x4ba   : > { %v1546_v44 = vmul.f32 0.5, %v1545_v48  ;;  %v1625_v48 = vld [vmem:[%s2601_s22 + $0x28] sm:$0xff] }
 0x4bb   : > { %v1604_v26 = vmul.f32 %v2595_v55, %v1594_v22  ;;  %v1502_v0 = vpop.xlane.xlu1 %1501  ;;  %1683 = vst.msk [vmem:[%s2620_s27] sm:$0xff] %vm807_vm2, %v1676_v1 }
 0x4bc   : > { %v1513_v40 = vmul.f32 %v1502_v0, %v2258_v25  ;;  %v1547_v51 = vsub.f32 1.5, %v1546_v44 }
 0x4bd   : > { %v2025_v29 = vpop.eup %2024  ;;  %v1614_v37 = vadd.f32 %v2606_v13, %v1604_v26 }
 0x4be   : > { %v1554_v58 = vmul.f32 %v2025_v29, %v1519_v17  ;;  %v1520_v21 = vadd.f32 1e-12, %v1513_v40  ;;  %vm1560_vm0 = vweird.f32 %v2025_v29  ;;  %v1548_v54 = vmul.f32 %v2614_v10, %v1547_v51 }
 0x4bf   : > { %v1628_v49 = vadd.f32 %v1621_v7, %v1614_v37  ;;  %vm1561_vm3 = vmor %vm1559_vm1, %vm1560_vm0  ;;  %v1622_v7 = vld [vmem:[%s2601_s22 + $0x10] sm:$0xff] }
 0x4c0   : > { %v1555_v39 = vmul.f32 %v2025_v29, %v1554_v58  ;;  %2026 = vrsqrt.f32 %v1520_v21  ;;  %v1552_v53 = vsel %vm2642_vm6, %v2614_v10, %v1548_v54  ;;  %vm1569_vm8 = vweird.f32 %v1520_v21 }
 0x4c1   : > { %v1677_v31 = vmul.f32 %v1649_v20, %v1628_v49  ;;  %v1595_v61 = vmul.f32 %v1552_v53, %v2553_v50 }
 0x4c2   : > { %v1556_v8 = vmul.f32 0.5, %v1555_v39 }
 0x4c3   : > { %v1505_v45 = vpop.xlane.xlu2 %1504  ;;  %1684 = vst.msk [vmem:[%s2620_s27 + $0x8] sm:$0xff] %vm807_vm2, %v1677_v31  ;;  %v1605_v17 = vmul.f32 %v2595_v55, %v1595_v61 }
 0x4c4   : > { %v1557_v46 = vsub.f32 1.5, %v1556_v8  ;;  %v1514_v24 = vmul.f32 %v1505_v45, %v2258_v25 }
 0x4c5   : > { %v1615_v2 = vadd.f32 %v2606_v13, %v1605_v17 }
 0x4c6   : > { %v2027_v42 = vpop.eup %2026  ;;  %v1558_v35 = vmul.f32 %v2025_v29, %v1557_v46  ;;  %v1521_v34 = vadd.f32 1e-12, %v1514_v24 }
 0x4c7   : > { %v1564_v16 = vmul.f32 %v2027_v42, %v1520_v21  ;;  %vm1570_vm7 = vweird.f32 %v2027_v42  ;;  %v1629_v58 = vadd.f32 %v1622_v7, %v1615_v2 }
 0x4c8   : > { %v1562_v52 = vsel %vm1561_vm3, %v2025_v29, %v1558_v35  ;;  %2028 = vrsqrt.f32 %v1521_v34  ;;  %vm1571_vm9 = vmor %vm1569_vm8, %vm1570_vm7  ;;  %vm1579_vm11 = vweird.f32 %v1521_v34 }
 0x4c9   : > { %v1565_v20 = vmul.f32 %v2027_v42, %v1564_v16  ;;  %v1596_v33 = vmul.f32 %v1562_v52, %v2559_v23 }
 0x4cb   : > { %v1566_v30 = vmul.f32 0.5, %v1565_v20  ;;  %v1606_v56 = vmul.f32 %v2595_v55, %v1596_v33  ;;  %v1508_v57 = vpop.xlane.xlu0 %1507  ;;  %v1659_v5 = vpop.permute.xlu2 %1658 }
 0x4cc   : > { %v1515_v60 = vmul.f32 %v1508_v57, %v2258_v25 }
 0x4cd   : > { %v1567_v62 = vsub.f32 1.5, %v1566_v30  ;;  %v1616_v23 = vadd.f32 %v2606_v13, %v1606_v56 }
 0x4ce   : > { %v2029_v63 = vpop.eup %2028  ;;  %v1522_v3 = vadd.f32 1e-12, %v1515_v60 }
 0x4cf   : > { %v1568_v4 = vmul.f32 %v2027_v42, %v1567_v62  ;;  %v1574_v27 = vmul.f32 %v2029_v63, %v1521_v34  ;;  %v1630_v25 = vadd.f32 %v1623_v32, %v1616_v23  ;;  %vm1580_vm10 = vweird.f32 %v2029_v63 }
 0x4d0   : > { %2030 = vrsqrt.f32 %v1522_v3  ;;  %vm1581_vm12 = vmor %vm1579_vm11, %vm1580_vm10  ;;  %vm1589_vm14 = vweird.f32 %v1522_v3 }
 0x4d1   : > { %v1572_v43 = vsel %vm1571_vm9, %v2027_v42, %v1568_v4  ;;  %v1575_v11 = vmul.f32 %v2029_v63, %v1574_v27  ;;  %v1679_v12 = vmul.f32 %v1659_v5, %v1630_v25  ;;  %v1626_v42 = vld [vmem:[%s2601_s22 + $0x30] sm:$0xff] }
 0x4d2   : > { %v1597_v47 = vmul.f32 %v1572_v43, %v2565_v28 }
 0x4d3   : > { %v1576_v59 = vmul.f32 0.5, %v1575_v11  ;;  %1686 = vst.msk [vmem:[%s2620_s27 + $0x18] sm:$0xff] %vm807_vm2, %v1679_v12  ;;  %v1664_v22 = vpop.permute.xlu1 %1663  ;;  %v1669_v8 = vpop.permute.xlu2 %1668 }
 0x4d4   : > { %v1607_v14 = vmul.f32 %v2595_v55, %v1597_v47 }
 0x4d5   : > { %v1577_v9 = vsub.f32 1.5, %v1576_v59 }
 0x4d6   : > { %v2031_v18 = vpop.eup %2030  ;;  %v1617_v10 = vadd.f32 %v2606_v13, %v1607_v14 }
 0x4d7   : > { %v1578_v15 = vmul.f32 %v2029_v63, %v1577_v9  ;;  %v1584_v50 = vmul.f32 %v2031_v18, %v1522_v3  ;;  %vm1590_vm13 = vweird.f32 %v2031_v18 }
 0x4d8   : > { %v1631_v28 = vadd.f32 %v1624_v6, %v1617_v10  ;;  %vm1591_vm15 = vmor %vm1589_vm14, %vm1590_vm13 }
 0x4d9   : > { %v1582_v19 = vsel %vm1581_vm12, %v2029_v63, %v1578_v15  ;;  %v1585_v1 = vmul.f32 %v2031_v18, %v1584_v50 }
 0x4da   : > { %v1598_v26 = vmul.f32 %v1582_v19, %v2571_v38  ;;  %v1680_v0 = vmul.f32 %v1664_v22, %v1631_v28 }
 0x4db   : > { %v1586_v40 = vmul.f32 0.5, %v1585_v1  ;;  %v1674_v34 = vpop.permute.xlu1 %1673 }
 0x4dc   : > { %v1608_v29 = vmul.f32 %v2595_v55, %v1598_v26  ;;  %1687 = vst.msk [vmem:[%s2620_s27 + $0x20] sm:$0xff] %vm807_vm2, %v1680_v0 }
 0x4dd   : > { %v1587_v37 = vsub.f32 1.5, %v1586_v40 }
 0x4de   : > { %v1618_v21 = vadd.f32 %v2606_v13, %v1608_v29  ;;  %v1654_v49 = vpop.permute.xlu0 %1653 }
 0x4df   : > { %v1588_v39 = vmul.f32 %v2031_v18, %v1587_v37  ;;  %v1678_v38 = vmul.f32 %v1654_v49, %v1629_v58 }
 0x4e0   : > { %v1632_v31 = vadd.f32 %v1625_v48, %v1618_v21 }
 0x4e1   : > { %v1592_v44 = vsel %vm1591_vm15, %v2031_v18, %v1588_v39  ;;  %1685 = vst.msk [vmem:[%s2620_s27 + $0x10] sm:$0xff] %vm807_vm2, %v1678_v38 }
 0x4e2   : > { %v1681_v45 = vmul.f32 %v1669_v8, %v1632_v31  ;;  %v1599_v46 = vmul.f32 %v1592_v44, %v2577_v41 }
 0x4e4   : > { %1688 = vst.msk [vmem:[%s2620_s27 + $0x28] sm:$0xff] %vm807_vm2, %v1681_v45  ;;  %v1609_v24 = vmul.f32 %v2595_v55, %v1599_v46 }
 0x4e6   : > { %v1619_v51 = vadd.f32 %v2606_v13, %v1609_v24 }
 0x4e8   : > { %v1633_v35 = vadd.f32 %v1626_v42, %v1619_v51 }
 0x4ea   : > { %v1682_v16 = vmul.f32 %v1674_v34, %v1633_v35 }
 0x4ec   : > { %1689 = vst.msk [vmem:[%s2620_s27 + $0x30] sm:$0xff] %vm807_vm2, %v1682_v16 }
 0x4ed PF: > { %s25_s18 = sadd.s32 1, %s2038_s18  }
 0x4ee   : > { %p22_p4 = scmp.ge.s32.totalorder %s25_s18, 4  }
 0x4f0   :  { %24 = sbr.rel (!%p22_p4) target bundleno = 1 (0x1), region = 116 }

</bundles_post_ra>
